<compile_context>
chip_gen: v6e
topology: v6e:2x2x1
jax: 0.10.0
libtpu: 0.0.40
codegen_flags: <defaults>
</compile_context>

<pallas_src>
import jax
import jax.numpy as jnp
from jax.experimental import pallas as pl
from jax.experimental.pallas import tpu as pltpu


def prepare_params(w_en, b_en, w_de, w_cv, w_wp):
    """Host-side re-layout of the PyTorch Linear weights into kernel-ready form."""
    return (jnp.asarray(w_en).T,                  # (De, Dt)  attn_en_in.weight.T
            jnp.asarray(b_en).reshape(1, -1),     # (1, Dt)   attn_en_in.bias
            jnp.asarray(w_de).T,                  # (Dt, Dt)  attn_de_in.weight.T
            jnp.asarray(w_cv).reshape(1, -1),     # (1, Dt)   attn_cv_in.weight (Dt,1)->(1,Dt)
            jnp.asarray(w_wp).reshape(1, -1))     # (1, Dt)   attn_warp_in.weight


def _make_kernel(nk, s_tile):
    """Kernel factory closing over the (static) number of sequence tiles."""

    def kernel(enhy_ref, dehy_ref, past_ref, mask_ref,
               w_en_ref, w_de_ref, b_en_ref, w_cv_ref, w_wp_ref,
               c_ref, attn_ref, ee_ref,
               m_sc, l_sc, acc_sc, p_sc, de_sc):
        k = pl.program_id(1)          # sequence-tile index (reduction axis, last)

        @pl.when(k == 0)
        def _init():
            m_sc[...] = jnp.full_like(m_sc, -jnp.inf)
            l_sc[...] = jnp.zeros_like(l_sc)
            acc_sc[...] = jnp.zeros_like(acc_sc)
            p_sc[...] = jnp.zeros_like(p_sc)
            # attn_de_in(dehy) + encoder bias: independent of the sequence axis,
            # computed once per batch tile and kept in scratch (f32).
            de_sc[...] = (jnp.dot(dehy_ref[...], w_de_ref[...],
                                  preferred_element_type=jnp.float32)
                          + b_en_ref[...])

        enhy = enhy_ref[...]          # (TB, S_tile, De)  compute dtype (bf16 default)
        past = past_ref[...]          # (TB, S_tile) f32
        mask_add = mask_ref[...]      # (TB, S_tile) f32 additive mask (0 or -1e20)
        w_cv = w_cv_ref[...]          # (1, Dt) f32
        w_wp = w_wp_ref[...]          # (1, Dt) f32

        tb, st, de = enhy.shape
        dt = w_cv.shape[1]

        # attn_en_in(enhy): MXU matmul, bf16 operands, f32 accumulate.
        en_proj = jnp.dot(enhy.reshape(tb * st, de), w_en_ref[...],
                          preferred_element_type=jnp.float32).reshape(tb, st, dt)

        # attn_cv_in(past_attn.unsqueeze(2)): coverage outer product on the VPU.
        cv_proj = past[:, :, None] * w_cv.reshape(1, 1, dt)

        attn_agg = jnp.tanh(en_proj + de_sc[...][:, None, :] + cv_proj)   # f32

        # attn_warp_in(attn_agg).squeeze(2): VPU multiply + lane reduce.
        ee = jnp.sum(attn_agg * w_wp.reshape(1, 1, dt), axis=-1)          # (TB, S_tile)
        ee = ee + mask_add            # masked_fill(|mask|==0, -1e20), stays f32
        ee_ref[...] = ee              # per-tile attn_ee output

        # ---- online (flash-style) softmax update ----
        m_prev = m_sc[...]
        m_new = jnp.maximum(m_prev, jnp.max(ee, axis=1, keepdims=True))
        alpha = jnp.exp(m_prev - m_new)            # == 0 at k == 0 (m_prev = -inf)
        p = jnp.exp(ee - m_new)                    # (TB, S_tile) f32

        l_sc[...] = alpha * l_sc[...] + jnp.sum(p, axis=1, keepdims=True)
        # context accumulation: batched MXU matmul with bf16 operands, f32 acc.
        acc_sc[...] = alpha * acc_sc[...] + jnp.einsum(
            'bqs,bsd->bqd', p[:, None, :].astype(enhy.dtype), enhy,
            preferred_element_type=jnp.float32)[:, 0, :]
        m_sc[...] = m_new

        # Rescale previously stored (unnormalized) weights, then store this tile.
        p_sc[...] = p_sc[...] * alpha
        # Static scatter (guaranteed lowering); untaken branches are skipped at
        # runtime.  An aligned dynamic pl.ds store is the cleaner alternative.
        for j in range(nk):
            @pl.when(k == j)
            def _store(j=j):
                p_sc[:, j * s_tile:(j + 1) * s_tile] = p

        @pl.when(k == nk - 1)
        def _finalize():
            l = l_sc[...]
            inv = pl.reciprocal(l, approx=True)    # EUP slot (otherwise idle)
            inv = inv * (2.0 - l * inv)            # one Newton step -> ~f32 accuracy
            attn_ref[...] = p_sc[...] * inv        # (TB, S_pad) lane-dense
            c_ref[...] = (acc_sc[...] * inv).astype(c_ref.dtype)

    return kernel


def attention_encoder(dehy, enhy, past_attn, src_mask, kernel_params, *,
                      batch_tile=8, seq_tile=512, compute_dtype=jnp.bfloat16):
    """Pallas wrapper: (batch, seq-tile) grid with online softmax over seq tiles."""
    w_en_t, b_en, w_de_t, w_cv, w_wp = kernel_params
    B, S, De = enhy.shape
    Dt = dehy.shape[1]

    assert seq_tile % 128 == 0, "seq_tile must be a multiple of 128 (lane width)"

    # Batch tiling: never pad tiny batches up to batch_tile; for larger batches
    # use a multiple-of-8 tile so nb >= 2 ("parallel" axis feeds both v7x TCs).
    if B > batch_tile:
        assert batch_tile % 8 == 0, "batch_tile must be a multiple of 8"
        TB = batch_tile
    else:
        TB = B
    B_pad = pl.cdiv(B, TB) * TB
    nb = B_pad // TB

    # Sequence tiling (multiple of 128 lanes).
    if S <= seq_tile:
        S_tile = pl.cdiv(S, 128) * 128
    else:
        S_tile = seq_tile
    S_pad = pl.cdiv(S, S_tile) * S_tile
    nk = S_pad // S_tile

    # Host-side padding / casting. Padded sequence positions and padded batch
    # rows get an additive mask of -1e20 (-> ~zero attention); padded batch rows
    # are sliced off below. enhy is stored in HBM at the MXU compute dtype so
    # the dominant HBM->VMEM DMA shrinks too.
    enhy_p = jnp.zeros((B_pad, S_pad, De), compute_dtype).at[:B, :S, :].set(
        enhy.astype(compute_dtype))
    dehy_p = jnp.zeros((B_pad, Dt), jnp.float32).at[:B, :].set(
        dehy.astype(jnp.float32))
    past_p = jnp.zeros((B_pad, S_pad), jnp.float32).at[:B, :S].set(
        past_attn.astype(jnp.float32))
    mask_add = jnp.where(jnp.abs(src_mask.astype(jnp.float32)) == 0.0,
                         jnp.float32(-1e20), jnp.float32(0.0))
    mask_p = jnp.full((B_pad, S_pad), -1e20, dtype=jnp.float32).at[:B, :S].set(mask_add)

    w_en_k = w_en_t.astype(compute_dtype)          # (De, Dt) MXU operand
    w_de_k = w_de_t.astype(jnp.float32)            # (Dt, Dt) small, keep f32
    b_en_k = b_en.astype(jnp.float32)
    w_cv_k = w_cv.astype(jnp.float32)
    w_wp_k = w_wp.astype(jnp.float32)

    # VMEM budget: derive the scoped limit from the tile footprint (raises the
    # v5e 16 MiB default when needed, stays within v7x's 64 MiB physical VMEM).
    isz = jnp.dtype(compute_dtype).itemsize
    vmem_est = (
        2 * TB * S_tile * De * isz                       # enhy (double-buffered)
        + 2 * 2 * TB * S_tile * 4                        # past + mask
        + 2 * TB * Dt * 4                                # dehy
        + 2 * (De * Dt * isz + Dt * Dt * 4 + 3 * Dt * 4)  # weights (x2 buffers)
        + TB * De * 4 + TB * S_pad * 4 + 2 * TB * S_tile * 4   # outputs
        + TB * (2 + De + Dt + S_pad) * 4                 # scratch
        + 3 * TB * S_tile * Dt * 4                       # live f32 intermediates
    )
    vmem_limit = int(min(max(2 * vmem_est, 32 * 1024 * 1024), 64 * 1024 * 1024))

    cost = pl.CostEstimate(
        flops=int(2 * B_pad * S_pad * De * Dt            # en_proj
                  + 2 * B_pad * Dt * Dt * nk             # de_proj
                  + 2 * B_pad * S_pad * De               # context matmul
                  + 8 * B_pad * S_pad * Dt),             # VPU adds/muls
        transcendentals=int(B_pad * S_pad * (Dt + 1)),   # tanh + exp
        bytes_accessed=int(enhy_p.size * isz
                           + (dehy_p.size + past_p.size + mask_p.size) * 4
                           + De * Dt * isz + (Dt * Dt + 3 * Dt) * 4
                           + (B_pad * De + 2 * B_pad * S_pad) * 4),
    )

    grid_spec = pltpu.PrefetchScalarGridSpec(
        num_scalar_prefetch=0,
        grid=(nb, nk),                                    # reduction axis last
        in_specs=(
            pl.BlockSpec((TB, S_tile, De), lambda b, k: (b, k, 0)),   # enhy
            pl.BlockSpec((TB, Dt), lambda b, k: (b, 0)),              # dehy
            pl.BlockSpec((TB, S_tile), lambda b, k: (b, k)),          # past_attn
            pl.BlockSpec((TB, S_tile), lambda b, k: (b, k)),          # additive mask
            pl.BlockSpec((De, Dt), lambda b, k: (0, 0)),              # w_en^T
            pl.BlockSpec((Dt, Dt), lambda b, k: (0, 0)),              # w_de^T
            pl.BlockSpec((1, Dt), lambda b, k: (0, 0)),               # b_en
            pl.BlockSpec((1, Dt), lambda b, k: (0, 0)),               # w_cv
            pl.BlockSpec((1, Dt), lambda b, k: (0, 0)),               # w_wp
        ),
        out_specs=(
            pl.BlockSpec((TB, De), lambda b, k: (b, 0)),              # c_encoder
            pl.BlockSpec((TB, S_pad), lambda b, k: (b, 0)),           # attn (lane-dense)
            pl.BlockSpec((TB, S_tile), lambda b, k: (b, k)),          # attn_ee (per tile)
        ),
        scratch_shapes=[
            pltpu.VMEM((TB, 1), jnp.float32),        # running max m
            pltpu.VMEM((TB, 1), jnp.float32),        # running denom l
            pltpu.VMEM((TB, De), jnp.float32),       # context accumulator
            pltpu.VMEM((TB, S_pad), jnp.float32),    # unnormalized softmax weights
            pltpu.VMEM((TB, Dt), jnp.float32),       # hoisted de_proj + bias
        ],
    )

    out_shape = (
        jax.ShapeDtypeStruct((B_pad, De), jnp.float32),
        jax.ShapeDtypeStruct((B_pad, S_pad), jnp.float32),
        jax.ShapeDtypeStruct((B_pad, S_pad), jnp.float32),
    )

    c_p, attn_p, ee_p = pl.pallas_call(
        _make_kernel(nk, S_tile),
        out_shape=out_shape,
        grid_spec=grid_spec,
        compiler_params=pltpu.CompilerParams(
            dimension_semantics=("parallel", "arbitrary"),
            vmem_limit_bytes=vmem_limit),
        cost_estimate=cost,
    )(enhy_p, dehy_p, past_p, mask_p, w_en_k, w_de_k, b_en_k, w_cv_k, w_wp_k)

    return c_p[:B], attn_p[:B, :S], ee_p[:B, :S]


def reference_forward(dehy, enhy, past_attn, src_mask, torch_params):
    """Pure-JAX re-implementation of the PyTorch forward (for verification)."""
    w_en, b_en, w_de, w_cv, w_wp = torch_params
    en_proj = jnp.einsum('bsd,td->bst', enhy, w_en) + b_en.reshape(1, 1, -1)
    de_proj = dehy @ w_de.T
    cv_proj = past_attn[:, :, None] * w_cv.reshape(1, 1, -1)
    attn_agg = jnp.tanh(en_proj + de_proj[:, None, :] + cv_proj)
    attn_ee = jnp.einsum('bst,t->bs', attn_agg, w_wp.reshape(-1))
    attn_ee = jnp.where(jnp.abs(src_mask) == 0.0, -1e20, attn_ee)
    attn = jax.nn.softmax(attn_ee, axis=1)
    c = jnp.einsum('bs,bsd->bd', attn, enhy)
    return c, attn, attn_ee


if __name__ == "__main__":
    # ---- small shapes consistent with the module's forward ----
    B, S = 2, 8
    SRC_H, TRG_H = 16, 32
    De, Dt = 2 * SRC_H, TRG_H

    key = jax.random.PRNGKey(0)
    ks = jax.random.split(key, 8)

    enhy = jax.random.normal(ks[0], (B, S, De), dtype=jnp.float32)
    dehy = jax.random.normal(ks[1], (B, Dt), dtype=jnp.float32)
    past_attn = jax.random.uniform(ks[2], (B, S), dtype=jnp.float32)
    src_mask = jnp.ones((B, S), dtype=jnp.float32).at[1, S - 2:].set(0.0)

    scale = 0.1
    w_en = scale * jax.random.normal(ks[3], (Dt, De), dtype=jnp.float32)  # attn_en_in.weight
    b_en = scale * jax.random.normal(ks[4], (Dt,), dtype=jnp.float32)     # attn_en_in.bias
    w_de = scale * jax.random.normal(ks[5], (Dt, Dt), dtype=jnp.float32)  # attn_de_in.weight
    w_cv = scale * jax.random.normal(ks[6], (Dt, 1), dtype=jnp.float32)   # attn_cv_in.weight
    w_wp = scale * jax.random.normal(ks[7], (1, Dt), dtype=jnp.float32)   # attn_warp_in.weight
    torch_params = (w_en, b_en, w_de, w_cv, w_wp)
    kernel_params = prepare_params(*torch_params)

    c_r, a_r, e_r = reference_forward(dehy, enhy, past_attn, src_mask, torch_params)

    # f32 MXU path: tight check of the online-softmax / tiling math.
    c32, a32, e32 = attention_encoder(dehy, enhy, past_attn, src_mask, kernel_params,
                                      compute_dtype=jnp.float32)
    jax.block_until_ready((c32, a32, e32))
    assert c32.shape == (B, De) and a32.shape == (B, S) and e32.shape == (B, S)
    assert jnp.allclose(c32, c_r, atol=1e-4, rtol=1e-4)
    assert jnp.allclose(a32, a_r, atol=1e-4, rtol=1e-4)
    assert jnp.allclose(e32, e_r, atol=1e-4, rtol=1e-4)

    # bf16 MXU path (default): looser tolerances (bf16 operand rounding).
    c16, a16, e16 = attention_encoder(dehy, enhy, past_attn, src_mask, kernel_params)
    jax.block_until_ready((c16, a16, e16))
    assert jnp.allclose(c16, c_r, atol=5e-2, rtol=5e-2)
    assert jnp.allclose(a16, a_r, atol=5e-2, rtol=5e-2)
    assert jnp.allclose(e16, e_r, atol=5e-2, rtol=5e-2)

    # Larger multi-tile case: exercises nb > 1 (parallel batch grid) and nk > 1
    # (sequence-tiled online softmax) plus batch & sequence padding.
    B2, S2 = 20, 300
    k2 = jax.random.split(jax.random.PRNGKey(1), 4)
    enhy2 = jax.random.normal(k2[0], (B2, S2, De), dtype=jnp.float32)
    dehy2 = jax.random.normal(k2[1], (B2, Dt), dtype=jnp.float32)
    past2 = jax.random.uniform(k2[2], (B2, S2), dtype=jnp.float32)
    lens = jax.random.randint(k2[3], (B2,), 1, S2 + 1)
    mask2 = (jnp.arange(S2)[None, :] < lens[:, None]).astype(jnp.float32)

    c_r2, a_r2, e_r2 = reference_forward(dehy2, enhy2, past2, mask2, torch_params)
    c2, a2, e2 = attention_encoder(dehy2, enhy2, past2, mask2, kernel_params,
                                   batch_tile=8, seq_tile=128,
                                   compute_dtype=jnp.float32)
    jax.block_until_ready((c2, a2, e2))
    assert c2.shape == (B2, De) and a2.shape == (B2, S2) and e2.shape == (B2, S2)
    assert jnp.allclose(c2, c_r2, atol=1e-4, rtol=1e-4)
    assert jnp.allclose(a2, a_r2, atol=1e-4, rtol=1e-4)
    assert jnp.allclose(e2, e_r2, atol=1e-4, rtol=1e-4)

    print("KERNEL_OK")
</pallas_src>

<mosaic_0001>
module attributes {stable_mosaic.version = 11 : i64} {
  func.func @kernel(%arg0: i32, %arg1: i32, %arg2: memref<2x128x32xf32, #tpu.memory_space<vmem>>, %arg3: memref<2x32xf32, #tpu.memory_space<vmem>>, %arg4: memref<2x128xf32, #tpu.memory_space<vmem>>, %arg5: memref<2x128xf32, #tpu.memory_space<vmem>>, %arg6: memref<32x32xf32, #tpu.memory_space<vmem>>, %arg7: memref<32x32xf32, #tpu.memory_space<vmem>>, %arg8: memref<1x32xf32, #tpu.memory_space<vmem>>, %arg9: memref<1x32xf32, #tpu.memory_space<vmem>>, %arg10: memref<1x32xf32, #tpu.memory_space<vmem>>, %arg11: memref<2x32xf32, #tpu.memory_space<vmem>>, %arg12: memref<2x128xf32, #tpu.memory_space<vmem>>, %arg13: memref<2x128xf32, #tpu.memory_space<vmem>>, %arg14: memref<2x1xf32, #tpu.memory_space<vmem>>, %arg15: memref<2x1xf32, #tpu.memory_space<vmem>>, %arg16: memref<2x32xf32, #tpu.memory_space<vmem>>, %arg17: memref<2x128xf32, #tpu.memory_space<vmem>>, %arg18: memref<2x32xf32, #tpu.memory_space<vmem>>) attributes {dimension_semantics = [#tpu.dimension_semantics<parallel>, #tpu.dimension_semantics<arbitrary>], iteration_bounds = array<i64: 1, 1>, scalar_prefetch = 0 : i64, scratch_operands = 5 : i64, tpu.core_type = #tpu.core_type<tc>, window_params = [{transform_indices = @transform_0, window_bounds = array<i64: 2, 128, 32>}, {transform_indices = @transform_1, window_bounds = array<i64: 2, 32>}, {transform_indices = @transform_2, window_bounds = array<i64: 2, 128>}, {transform_indices = @transform_3, window_bounds = array<i64: 2, 128>}, {pipeline_mode = #tpu.pipeline_mode<synchronous>, transform_indices = @transform_4, window_bounds = array<i64: 32, 32>}, {pipeline_mode = #tpu.pipeline_mode<synchronous>, transform_indices = @transform_5, window_bounds = array<i64: 32, 32>}, {pipeline_mode = #tpu.pipeline_mode<synchronous>, transform_indices = @transform_6, window_bounds = array<i64: 1, 32>}, {pipeline_mode = #tpu.pipeline_mode<synchronous>, transform_indices = @transform_7, window_bounds = array<i64: 1, 32>}, {pipeline_mode = #tpu.pipeline_mode<synchronous>, transform_indices = @transform_8, window_bounds = array<i64: 1, 32>}, {transform_indices = @transform_9, window_bounds = array<i64: 2, 32>}, {transform_indices = @transform_10, window_bounds = array<i64: 2, 128>}, {transform_indices = @transform_11, window_bounds = array<i64: 2, 128>}]} {
    %c0_i32 = arith.constant 0 : i32
    %0 = arith.cmpi eq, %arg1, %c0_i32 : i32
    %1 = arith.extui %0 : i1 to i32
    %c0_i32_0 = arith.constant 0 : i32
    %2 = arith.cmpi ne, %1, %c0_i32_0 : i32
    scf.if %2 {
      %cst_41 = arith.constant 0xFF800000 : f32
      %63 = vector.broadcast %cst_41 : f32 to vector<2x1xf32>
      %c0_42 = arith.constant 0 : index
      %c0_43 = arith.constant 0 : index
      %64 = vector.load %arg14[%c0_42, %c0_43] : memref<2x1xf32, #tpu.memory_space<vmem>>, vector<2x1xf32>
      tpu.vector_store %arg14[%c0_42, %c0_43], %63 {strides = array<i32>} : memref<2x1xf32, #tpu.memory_space<vmem>>, vector<2x1xf32>,
      %cst_44 = arith.constant 0.000000e+00 : f32
      %65 = vector.broadcast %cst_44 : f32 to vector<2x1xf32>
      %c0_45 = arith.constant 0 : index
      %c0_46 = arith.constant 0 : index
      %66 = vector.load %arg15[%c0_45, %c0_46] : memref<2x1xf32, #tpu.memory_space<vmem>>, vector<2x1xf32>
      tpu.vector_store %arg15[%c0_45, %c0_46], %65 {strides = array<i32>} : memref<2x1xf32, #tpu.memory_space<vmem>>, vector<2x1xf32>,
      %cst_47 = arith.constant 0.000000e+00 : f32
      %67 = vector.broadcast %cst_47 : f32 to vector<2x32xf32>
      %c0_48 = arith.constant 0 : index
      %c0_49 = arith.constant 0 : index
      %68 = vector.load %arg16[%c0_48, %c0_49] : memref<2x32xf32, #tpu.memory_space<vmem>>, vector<2x32xf32>
      tpu.vector_store %arg16[%c0_48, %c0_49], %67 {strides = array<i32>} : memref<2x32xf32, #tpu.memory_space<vmem>>, vector<2x32xf32>,
      %cst_50 = arith.constant 0.000000e+00 : f32
      %69 = vector.broadcast %cst_50 : f32 to vector<2x128xf32>
      %c0_51 = arith.constant 0 : index
      %c0_52 = arith.constant 0 : index
      %70 = vector.load %arg17[%c0_51, %c0_52] : memref<2x128xf32, #tpu.memory_space<vmem>>, vector<2x128xf32>
      tpu.vector_store %arg17[%c0_51, %c0_52], %69 {strides = array<i32>} : memref<2x128xf32, #tpu.memory_space<vmem>>, vector<2x128xf32>,
      %c0_53 = arith.constant 0 : index
      %c0_54 = arith.constant 0 : index
      %71 = vector.load %arg3[%c0_53, %c0_54] : memref<2x32xf32, #tpu.memory_space<vmem>>, vector<2x32xf32>
      %c0_55 = arith.constant 0 : index
      %c0_56 = arith.constant 0 : index
      %72 = vector.load %arg7[%c0_55, %c0_56] : memref<32x32xf32, #tpu.memory_space<vmem>>, vector<32x32xf32>
      %cst_57 = arith.constant dense<0.000000e+00> : vector<2x32xf32>
      %73 = tpu.matmul %71, %72, %cst_57 {dimension_numbers = #tpu.dot_dimension_numbers<[1], [0], [0], [1], [0, 0, 1, 1], [], []>} : vector<2x32xf32>, vector<32x32xf32>, vector<2x32xf32> -> vector<2x32xf32>
      %c0_58 = arith.constant 0 : index
      %c0_59 = arith.constant 0 : index
      %74 = vector.load %arg8[%c0_58, %c0_59] : memref<1x32xf32, #tpu.memory_space<vmem>>, vector<1x32xf32>
      %75 = vector.broadcast %74 : vector<1x32xf32> to vector<2x32xf32>
      %76 = arith.addf %73, %75 : vector<2x32xf32>
      %c0_60 = arith.constant 0 : index
      %c0_61 = arith.constant 0 : index
      %77 = vector.load %arg18[%c0_60, %c0_61] : memref<2x32xf32, #tpu.memory_space<vmem>>, vector<2x32xf32>
      tpu.vector_store %arg18[%c0_60, %c0_61], %76 {strides = array<i32>} : memref<2x32xf32, #tpu.memory_space<vmem>>, vector<2x32xf32>,
    } else {
    }
    %c0 = arith.constant 0 : index
    %c0_1 = arith.constant 0 : index
    %c0_2 = arith.constant 0 : index
    %3 = vector.load %arg2[%c0, %c0_1, %c0_2] : memref<2x128x32xf32, #tpu.memory_space<vmem>>, vector<2x128x32xf32>
    %c0_3 = arith.constant 0 : index
    %c0_4 = arith.constant 0 : index
    %4 = vector.load %arg4[%c0_3, %c0_4] : memref<2x128xf32, #tpu.memory_space<vmem>>, vector<2x128xf32>
    %c0_5 = arith.constant 0 : index
    %c0_6 = arith.constant 0 : index
    %5 = vector.load %arg5[%c0_5, %c0_6] : memref<2x128xf32, #tpu.memory_space<vmem>>, vector<2x128xf32>
    %c0_7 = arith.constant 0 : index
    %c0_8 = arith.constant 0 : index
    %6 = vector.load %arg9[%c0_7, %c0_8] : memref<1x32xf32, #tpu.memory_space<vmem>>, vector<1x32xf32>
    %c0_9 = arith.constant 0 : index
    %c0_10 = arith.constant 0 : index
    %7 = vector.load %arg10[%c0_9, %c0_10] : memref<1x32xf32, #tpu.memory_space<vmem>>, vector<1x32xf32>
    %8 = vector.shape_cast %3 : vector<2x128x32xf32> to vector<256x32xf32>
    %c0_11 = arith.constant 0 : index
    %c0_12 = arith.constant 0 : index
    %9 = vector.load %arg6[%c0_11, %c0_12] : memref<32x32xf32, #tpu.memory_space<vmem>>, vector<32x32xf32>
    %cst = arith.constant dense<0.000000e+00> : vector<256x32xf32>
    %10 = tpu.matmul %8, %9, %cst {dimension_numbers = #tpu.dot_dimension_numbers<[1], [0], [0], [1], [0, 0, 1, 1], [], []>} : vector<256x32xf32>, vector<32x32xf32>, vector<256x32xf32> -> vector<256x32xf32>
    %11 = vector.shape_cast %10 : vector<256x32xf32> to vector<2x128x32xf32>
    %12 = vector.shape_cast %4 : vector<2x128xf32> to vector<2x128x1xf32>
    %13 = vector.shape_cast %6 : vector<1x32xf32> to vector<1x1x32xf32>
    %14 = vector.broadcast %12 : vector<2x128x1xf32> to vector<2x128x32xf32>
    %15 = vector.broadcast %13 : vector<1x1x32xf32> to vector<2x128x32xf32>
    %16 = arith.mulf %14, %15 : vector<2x128x32xf32>
    %c0_13 = arith.constant 0 : index
    %c0_14 = arith.constant 0 : index
    %17 = vector.load %arg18[%c0_13, %c0_14] : memref<2x32xf32, #tpu.memory_space<vmem>>, vector<2x32xf32>
    %18 = vector.shape_cast %17 : vector<2x32xf32> to vector<2x1x32xf32>
    %19 = vector.broadcast %18 : vector<2x1x32xf32> to vector<2x128x32xf32>
    %20 = arith.addf %11, %19 : vector<2x128x32xf32>
    %21 = arith.addf %20, %16 : vector<2x128x32xf32>
    %22 = math.tanh %21 : vector<2x128x32xf32>
    %23 = vector.shape_cast %7 : vector<1x32xf32> to vector<1x1x32xf32>
    %24 = vector.broadcast %23 : vector<1x1x32xf32> to vector<2x128x32xf32>
    %25 = arith.mulf %22, %24 : vector<2x128x32xf32>
    %cst_15 = arith.constant dense<0.000000e+00> : vector<2x128xf32>
    %26 = vector.multi_reduction <add>, %25, %cst_15 [2] : vector<2x128x32xf32> to vector<2x128xf32>
    %27 = arith.addf %26, %5 : vector<2x128xf32>
    %c0_16 = arith.constant 0 : index
    %c0_17 = arith.constant 0 : index
    %28 = vector.load %arg13[%c0_16, %c0_17] : memref<2x128xf32, #tpu.memory_space<vmem>>, vector<2x128xf32>
    tpu.vector_store %arg13[%c0_16, %c0_17], %27 {strides = array<i32>} : memref<2x128xf32, #tpu.memory_space<vmem>>, vector<2x128xf32>,
    %c0_18 = arith.constant 0 : index
    %c0_19 = arith.constant 0 : index
    %29 = vector.load %arg14[%c0_18, %c0_19] : memref<2x1xf32, #tpu.memory_space<vmem>>, vector<2x1xf32>
    %cst_20 = arith.constant dense<0xFF800000> : vector<2xf32>
    %30 = vector.multi_reduction <maximumf>, %27, %cst_20 [1] : vector<2x128xf32> to vector<2xf32>
    %31 = vector.shape_cast %30 : vector<2xf32> to vector<2x1xf32>
    %32 = arith.maximumf %29, %31 : vector<2x1xf32>
    %33 = arith.subf %29, %32 : vector<2x1xf32>
    %34 = math.exp %33 : vector<2x1xf32>
    %35 = vector.broadcast %32 : vector<2x1xf32> to vector<2x128xf32>
    %36 = arith.subf %27, %35 : vector<2x128xf32>
    %37 = math.exp %36 : vector<2x128xf32>
    %c0_21 = arith.constant 0 : index
    %c0_22 = arith.constant 0 : index
    %38 = vector.load %arg15[%c0_21, %c0_22] : memref<2x1xf32, #tpu.memory_space<vmem>>, vector<2x1xf32>
    %39 = arith.mulf %34, %38 : vector<2x1xf32>
    %cst_23 = arith.constant dense<0.000000e+00> : vector<2xf32>
    %40 = vector.multi_reduction <add>, %37, %cst_23 [1] : vector<2x128xf32> to vector<2xf32>
    %41 = vector.shape_cast %40 : vector<2xf32> to vector<2x1xf32>
    %42 = arith.addf %39, %41 : vector<2x1xf32>
    %c0_24 = arith.constant 0 : index
    %c0_25 = arith.constant 0 : index
    %43 = vector.load %arg15[%c0_24, %c0_25] : memref<2x1xf32, #tpu.memory_space<vmem>>, vector<2x1xf32>
    tpu.vector_store %arg15[%c0_24, %c0_25], %42 {strides = array<i32>} : memref<2x1xf32, #tpu.memory_space<vmem>>, vector<2x1xf32>,
    %c0_26 = arith.constant 0 : index
    %c0_27 = arith.constant 0 : index
    %44 = vector.load %arg16[%c0_26, %c0_27] : memref<2x32xf32, #tpu.memory_space<vmem>>, vector<2x32xf32>
    %45 = vector.broadcast %34 : vector<2x1xf32> to vector<2x32xf32>
    %46 = arith.mulf %45, %44 : vector<2x32xf32>
    %47 = vector.shape_cast %37 : vector<2x128xf32> to vector<2x1x128xf32>
    "tpu.trace_start"() <{level = 10 : i32, message = "bqs,bsd->bqd"}> : () -> ()
    %cst_28 = arith.constant dense<0.000000e+00> : vector<2x1x32xf32>
    %48 = tpu.matmul %47, %3, %cst_28 {dimension_numbers = #tpu.dot_dimension_numbers<[2], [1], [1], [2], [0, 0, 0, 1, 1, 2], [0], [0]>} : vector<2x1x128xf32>, vector<2x128x32xf32>, vector<2x1x32xf32> -> vector<2x1x32xf32>
    "tpu.trace_stop"() : () -> ()
    %49 = vector.shape_cast %48 : vector<2x1x32xf32> to vector<2x32xf32>
    %50 = arith.addf %46, %49 : vector<2x32xf32>
    %c0_29 = arith.constant 0 : index
    %c0_30 = arith.constant 0 : index
    %51 = vector.load %arg16[%c0_29, %c0_30] : memref<2x32xf32, #tpu.memory_space<vmem>>, vector<2x32xf32>
    tpu.vector_store %arg16[%c0_29, %c0_30], %50 {strides = array<i32>} : memref<2x32xf32, #tpu.memory_space<vmem>>, vector<2x32xf32>,
    %c0_31 = arith.constant 0 : index
    %c0_32 = arith.constant 0 : index
    %52 = vector.load %arg14[%c0_31, %c0_32] : memref<2x1xf32, #tpu.memory_space<vmem>>, vector<2x1xf32>
    tpu.vector_store %arg14[%c0_31, %c0_32], %32 {strides = array<i32>} : memref<2x1xf32, #tpu.memory_space<vmem>>, vector<2x1xf32>,
    %c0_33 = arith.constant 0 : index
    %c0_34 = arith.constant 0 : index
    %53 = vector.load %arg17[%c0_33, %c0_34] : memref<2x128xf32, #tpu.memory_space<vmem>>, vector<2x128xf32>
    %54 = vector.broadcast %34 : vector<2x1xf32> to vector<2x128xf32>
    %55 = arith.mulf %53, %54 : vector<2x128xf32>
    %c0_35 = arith.constant 0 : index
    %c0_36 = arith.constant 0 : index
    %56 = vector.load %arg17[%c0_35, %c0_36] : memref<2x128xf32, #tpu.memory_space<vmem>>, vector<2x128xf32>
    tpu.vector_store %arg17[%c0_35, %c0_36], %55 {strides = array<i32>} : memref<2x128xf32, #tpu.memory_space<vmem>>, vector<2x128xf32>,
    %c0_i32_37 = arith.constant 0 : i32
    %57 = arith.cmpi eq, %arg1, %c0_i32_37 : i32
    %58 = arith.extui %57 : i1 to i32
    %c0_i32_38 = arith.constant 0 : i32
    %59 = arith.cmpi ne, %58, %c0_i32_38 : i32
    scf.if %59 {
      %c0_41 = arith.constant 0 : index
      %c0_42 = arith.constant 0 : index
      %63 = vector.load %arg17[%c0_41, %c0_42] : memref<2x128xf32, #tpu.memory_space<vmem>>, vector<2x128xf32>
      tpu.vector_store %arg17[%c0_41, %c0_42], %37 {strides = array<i32>} : memref<2x128xf32, #tpu.memory_space<vmem>>, vector<2x128xf32>,
    } else {
    }
    %c0_i32_39 = arith.constant 0 : i32
    %60 = arith.cmpi eq, %arg1, %c0_i32_39 : i32
    %61 = arith.extui %60 : i1 to i32
    %c0_i32_40 = arith.constant 0 : i32
    %62 = arith.cmpi ne, %61, %c0_i32_40 : i32
    scf.if %62 {
      %c0_41 = arith.constant 0 : index
      %c0_42 = arith.constant 0 : index
      %63 = vector.load %arg15[%c0_41, %c0_42] : memref<2x1xf32, #tpu.memory_space<vmem>>, vector<2x1xf32>
      %64 = tpu.reciprocal %63 {approx = true} : vector<2x1xf32> -> vector<2x1xf32>
      %65 = arith.mulf %63, %64 : vector<2x1xf32>
      %cst_43 = arith.constant 2.000000e+00 : f32
      %66 = vector.broadcast %cst_43 : f32 to vector<2x1xf32>
      %67 = arith.subf %66, %65 : vector<2x1xf32>
      %68 = arith.mulf %64, %67 : vector<2x1xf32>
      %c0_44 = arith.constant 0 : index
      %c0_45 = arith.constant 0 : index
      %69 = vector.load %arg17[%c0_44, %c0_45] : memref<2x128xf32, #tpu.memory_space<vmem>>, vector<2x128xf32>
      %70 = vector.broadcast %68 : vector<2x1xf32> to vector<2x128xf32>
      %71 = arith.mulf %69, %70 : vector<2x128xf32>
      %c0_46 = arith.constant 0 : index
      %c0_47 = arith.constant 0 : index
      %72 = vector.load %arg12[%c0_46, %c0_47] : memref<2x128xf32, #tpu.memory_space<vmem>>, vector<2x128xf32>
      tpu.vector_store %arg12[%c0_46, %c0_47], %71 {strides = array<i32>} : memref<2x128xf32, #tpu.memory_space<vmem>>, vector<2x128xf32>,
      %c0_48 = arith.constant 0 : index
      %c0_49 = arith.constant 0 : index
      %73 = vector.load %arg16[%c0_48, %c0_49] : memref<2x32xf32, #tpu.memory_space<vmem>>, vector<2x32xf32>
      %74 = vector.broadcast %68 : vector<2x1xf32> to vector<2x32xf32>
      %75 = arith.mulf %73, %74 : vector<2x32xf32>
      %c0_50 = arith.constant 0 : index
      %c0_51 = arith.constant 0 : index
      %76 = vector.load %arg11[%c0_50, %c0_51] : memref<2x32xf32, #tpu.memory_space<vmem>>, vector<2x32xf32>
      tpu.vector_store %arg11[%c0_50, %c0_51], %75 {strides = array<i32>} : memref<2x32xf32, #tpu.memory_space<vmem>>, vector<2x32xf32>,
    } else {
    }
    return
  }
  func.func @transform_0(%arg0: i32, %arg1: i32) -> (i32, i32, i32) {
    %c0_i32 = arith.constant 0 : i32
    %c0_i32_0 = arith.constant 0 : i32
    return %arg0, %arg1, %c0_i32 : i32, i32, i32
  }
  func.func @transform_1(%arg0: i32, %arg1: i32) -> (i32, i32) {
    %c0_i32 = arith.constant 0 : i32
    %c0_i32_0 = arith.constant 0 : i32
    return %arg0, %c0_i32 : i32, i32
  }
  func.func @transform_2(%arg0: i32, %arg1: i32) -> (i32, i32) {
    %c0_i32 = arith.constant 0 : i32
    return %arg0, %arg1 : i32, i32
  }
  func.func @transform_3(%arg0: i32, %arg1: i32) -> (i32, i32) {
    %c0_i32 = arith.constant 0 : i32
    return %arg0, %arg1 : i32, i32
  }
  func.func @transform_4(%arg0: i32, %arg1: i32) -> (i32, i32) {
    %c0_i32 = arith.constant 0 : i32
    %c0_i32_0 = arith.constant 0 : i32
    %c0_i32_1 = arith.constant 0 : i32
    return %c0_i32, %c0_i32_0 : i32, i32
  }
  func.func @transform_5(%arg0: i32, %arg1: i32) -> (i32, i32) {
    %c0_i32 = arith.constant 0 : i32
    %c0_i32_0 = arith.constant 0 : i32
    %c0_i32_1 = arith.constant 0 : i32
    return %c0_i32, %c0_i32_0 : i32, i32
  }
  func.func @transform_6(%arg0: i32, %arg1: i32) -> (i32, i32) {
    %c0_i32 = arith.constant 0 : i32
    %c0_i32_0 = arith.constant 0 : i32
    %c0_i32_1 = arith.constant 0 : i32
    return %c0_i32, %c0_i32_0 : i32, i32
  }
  func.func @transform_7(%arg0: i32, %arg1: i32) -> (i32, i32) {
    %c0_i32 = arith.constant 0 : i32
    %c0_i32_0 = arith.constant 0 : i32
    %c0_i32_1 = arith.constant 0 : i32
    return %c0_i32, %c0_i32_0 : i32, i32
  }
  func.func @transform_8(%arg0: i32, %arg1: i32) -> (i32, i32) {
    %c0_i32 = arith.constant 0 : i32
    %c0_i32_0 = arith.constant 0 : i32
    %c0_i32_1 = arith.constant 0 : i32
    return %c0_i32, %c0_i32_0 : i32, i32
  }
  func.func @transform_9(%arg0: i32, %arg1: i32) -> (i32, i32) {
    %c0_i32 = arith.constant 0 : i32
    %c0_i32_0 = arith.constant 0 : i32
    return %arg0, %c0_i32 : i32, i32
  }
  func.func @transform_10(%arg0: i32, %arg1: i32) -> (i32, i32) {
    %c0_i32 = arith.constant 0 : i32
    %c0_i32_0 = arith.constant 0 : i32
    return %arg0, %c0_i32 : i32, i32
  }
  func.func @transform_11(%arg0: i32, %arg1: i32) -> (i32, i32) {
    %c0_i32 = arith.constant 0 : i32
    return %arg0, %arg1 : i32, i32
  }
}

</mosaic_0001>

<bundles_post_ra>
// kernel: tpu_custom_call.1
= control target key start
LH: loop header
LB: loop body
LE: loop exit
PB: predicated region body
PF: predicated region fallthrough
CT: control target
= control target key end

     0   :  { %17 = vsyncpa [#allocation8], 0  ;;  %v496_v3 = vlaneseq  ;;  %v3740_v4 = vmov 0.0   ;;  %vm59_vm0 = vcmask 261120   ;;  %vm3761_vm1 = vmmov 0   ;;  %s3728_s0 = inlined_call_operand.vmem [shape: f32[2,128,32], index: 0, kind: input, shape index: {}]   ;;  %s3729_s1 = inlined_call_operand.vmem [shape: f32[2,32], index: 1, kind: input, shape index: {}]   ;;  %s3730_s2 = inlined_call_operand.vmem [shape: f32[2,128], index: 2, kind: input, shape index: {}]   ;;  %s3731_s3 = inlined_call_operand.vmem [shape: f32[2,128], index: 3, kind: input, shape index: {}]   ;;  %s3732_s4 = inlined_call_operand.vmem [shape: f32[32,32], index: 4, kind: input, shape index: {}]   ;;  %s3733_s5 = inlined_call_operand.vmem [shape: f32[32,32], index: 5, kind: input, shape index: {}]   ;;  %s3734_s6 = inlined_call_operand.vmem [shape: f32[1,32], index: 6, kind: input, shape index: {}]   ;;  %s3735_s7 = inlined_call_operand.vmem [shape: f32[1,32], index: 7, kind: input, shape index: {}]   ;;  %s3736_s8 = inlined_call_operand.vmem [shape: f32[1,32], index: 8, kind: input, shape index: {}]   ;;  %s3737_s9 = inlined_call_operand.hbm [shape: f32[2,32], index: 9, kind: output, shape index: {0}]   ;;  %s3738_s10 = inlined_call_operand.hbm [shape: f32[2,128], index: 10, kind: output, shape index: {1}]   ;;  %s3739_s11 = inlined_call_operand.hbm [shape: f32[2,128], index: 11, kind: output, shape index: {2}]  }
   0x1   :  { %v173_v0 = vld [vmem:[%s3732_s4 + $0x18] sm:$0xff]  ;;  %v172_v2 = vld [vmem:[%s3732_s4 + $0x10] sm:$0xff]  ;;  %2202 = vmatprep.subr.mxu0 %v3740_v4  ;;  %46 = vst [vmem:[#allocation5] sm:$0x3] %v3740_v4  ;;  %v171_v6 = vld [vmem:[%s3732_s4 + $0x8] sm:$0xff]  ;;  %2210 = vmatprep.mubr.msk.f32.mxu0 %vm3761_vm1, %v3740_v4 }
   0x2   :  { %v51_v1 = vld [vmem:[%s3733_s5 + $0x18] sm:$0xff]  ;;  %2213 = vmatprep.subr.mxu1 %v173_v0  ;;  %v50_v5 = vld [vmem:[%s3733_s5 + $0x10] sm:$0xff]  ;;  %v49_v7 = vld [vmem:[%s3733_s5 + $0x8] sm:$0xff]  ;;  %v2654_v9 = vshrl.u32 %v496_v3, 7 }
   0x3   :  { %2203 = vmatpush3.msra.mxu0 %v51_v1  ;;  %2214 = vmatpush3.msra.mxu1 %v173_v0  ;;  %v170_v8 = vld [vmem:[%s3732_s4] sm:$0xff]  ;;  %v2672_v13 = vld [vmem:[%s3728_s0 + $0x8] sm:$0xff]  ;;  %v2679_v14 = vld [vmem:[%s3728_s0 + $0x10] sm:$0xff] }
   0x4   :  { %2204 = vmatprep.subr.mxu0 %v3740_v4  ;;  %2215 = vmatprep.subr.mxu1 %v172_v2  ;;  %v48_v10 = vld [vmem:[%s3733_s5] sm:$0xff]  ;;  %v2682_v15 = vsub.s32 0, %v2654_v9  ;;  %v2685_v16 = vsub.s32 1, %v2654_v9  ;;  %v2697_v17 = vld [vmem:[%s3728_s0 + $0x18] sm:$0xff]  ;;  %v2728_v23 = vld [vmem:[%s3728_s0 + $0x28] sm:$0xff] }
   0x5   :  { %2205 = vmatpush3.msra.mxu0 %v50_v5  ;;  %2216 = vmatpush3.msra.mxu1 %v172_v2  ;;  %v2663_v11 = vld [vmem:[%s3728_s0] sm:$0xff]  ;;  %v149_v18 = vld [vmem:[%s3728_s0 + $0x78] sm:$0xff]  ;;  %v148_v24 = vld [vmem:[%s3728_s0 + $0x70] sm:$0xff] }
   0x6   :  { %2206 = vmatprep.subr.mxu0 %v3740_v4  ;;  %2217 = vmatprep.subr.mxu1 %v171_v6  ;;  %v47_v12 = vld [vmem:[%s3729_s1] sm:$0x3] }
   0x7   :  { %2207 = vmatpush3.msra.mxu0 %v49_v7  ;;  %2218 = vmatpush3.msra.mxu1 %v171_v6  ;;  %v166_v19 = vld [vmem:[%s3730_s2] sm:$0x3] }
   0x8   :  { %2208 = vmatprep.subr.mxu0 %v3740_v4  ;;  %2219 = vmatprep.subr.mxu1 %v170_v8  ;;  %v2709_v20 = vld [vmem:[%s3728_s0 + $0x20] sm:$0xff]  ;;  %v2712_v21 = vrot.slane %v166_v19, %v2682_v15  ;;  %v2715_v22 = vrot.slane %v166_v19, %v2685_v16 }
   0x9   :  { %2209 = vmatpush3.msra.mxu0 %v48_v10  ;;  %2220 = vmatpush3.msra.mxu1 %v170_v8 }
   0xa   :  { %2221 = vmatprep.mubr.msk.f32.mxu1 %vm59_vm0, %v2663_v11  ;;  %2211 = vmatmul.mubr.msk.f32.vlgmr.msra.gmra.mxu0 %vm59_vm0, %v47_v12 }
   0xb   :  { %2222 = vmatmul.mubr.msk.f32.vlgmr.msra.gmra.mxu1 %vm59_vm0, %v2672_v13  ;;  %2269 = vmatprep.subr.mxu0 %v3740_v4 }
   0xc   :  { %2224 = vmatprep.mubr.msk.f32.mxu1 %vm59_vm0, %v2679_v14  ;;  %2270 = vmatpush3.msra.mxu0 %v149_v18 }
   0xd   :  { %2301 = vmatprep.mubr.msk.f32.mxu0 %vm3761_vm1, %v3740_v4  ;;  %2271 = vmatprep.subr.mxu0 %v3740_v4 }
   0xe   :  { %501 = vbcast.lane.b32.xlu0 %v2712_v21, 256  ;;  %568 = vbcast.lane.b32.xlu1 %v2715_v22, 256 }
   0xf   :  { %2225 = vmatmul.mubr.msk.f32.gmra.mxu1 %vm59_vm0, %v2697_v17 }
  0x10   :  { %2227 = vmatprep.mubr.msk.f32.mxu1 %vm59_vm0, %v2709_v20 }
  0x11   :  { %18 = vsyncpa [#allocation10], 0  ;;  %v2737_v25 = vld [vmem:[%s3728_s0 + $0x30] sm:$0xff]  ;;  %2272 = vmatpush3.msra.mxu0 %v148_v24  ;;  %v141_v26 = vld [vmem:[%s3728_s0 + $0x38] sm:$0xff]  ;;  %vm3760_vm2 = vcmask 254976   ;;  %vm1270_vm3 = vcmask 130112  }
  0x12   :  { %2273 = vmatprep.subr.mxu0 %v3740_v4  ;;  %505 = vbcast.lane.b32.xlu0 %v2712_v21, 264  ;;  %v147_v27 = vld [vmem:[%s3728_s0 + $0x68] sm:$0xff]  ;;  %v142_v28 = vld [vmem:[%s3728_s0 + $0x40] sm:$0xff]  ;;  %v144_v31 = vld [vmem:[%s3728_s0 + $0x50] sm:$0xff]  ;;  %45 = vst.msk [vmem:[#allocation4] sm:$0x3] %vm3760_vm2, %v3740_v4 }
  0x13   :  { %2228 = vmatmul.mubr.msk.f32.gmra.mxu1 %vm59_vm0, %v2728_v23  ;;  %572 = vbcast.lane.b32.xlu1 %v2715_v22, 264  ;;  %v143_v29 = vld [vmem:[%s3728_s0 + $0x48] sm:$0xff]  ;;  %v146_v30 = vld [vmem:[%s3728_s0 + $0x60] sm:$0xff]  ;;  %v145_v32 = vld [vmem:[%s3728_s0 + $0x58] sm:$0xff]  ;;  %v2563_v8 = vmov 1966171168  }
  0x14   :  { %2230 = vmatprep.mubr.msk.f32.mxu1 %vm59_vm0, %v2737_v25  ;;  %2274 = vmatpush3.msra.mxu0 %v147_v27  ;;  %v150_v33 = vld [vmem:[%s3728_s0 + $0x80] sm:$0xff]  ;;  %v151_v34 = vld [vmem:[%s3728_s0 + $0x88] sm:$0xff]  ;;  %v152_v35 = vld [vmem:[%s3728_s0 + $0x90] sm:$0xff]  ;;  %v679_v10 = vunpack.c.l.s4 %v2563_v8  ;;  %vm1277_vm4 = vcmask 195712   ;;  %vm1284_vm5 = vcmask 261312   ;;  %vm1291_vm6 = vcmask 326912  }
  0x15   :  { %2275 = vmatprep.subr.mxu0 %v3740_v4  ;;  %v153_v36 = vld [vmem:[%s3728_s0 + $0x98] sm:$0xff]  ;;  %v154_v37 = vld [vmem:[%s3728_s0 + $0xa0] sm:$0xff]  ;;  %v155_v38 = vld [vmem:[%s3728_s0 + $0xa8] sm:$0xff]  ;;  %vm1298_vm7 = vcmask 392512   ;;  %vm1305_vm8 = vcmask 458112   ;;  %vm1312_vm9 = vcmask 523712  }
  0x16   :  { %509 = vbcast.lane.b32.xlu0 %v2712_v21, 272  ;;  %2276 = vmatpush3.msra.mxu0 %v146_v30  ;;  %v156_v39 = vld [vmem:[%s3728_s0 + $0xb0] sm:$0xff]  ;;  %v157_v40 = vld [vmem:[%s3728_s0 + $0xb8] sm:$0xff]  ;;  %v158_v41 = vld [vmem:[%s3728_s0 + $0xc0] sm:$0xff]  ;;  %vm1319_vm10 = vcmask 589312   ;;  %vm1326_vm11 = vcmask 654912  }
  0x17   :  { %2231 = vmatmul.mubr.msk.f32.gmra.mxu1 %vm59_vm0, %v141_v26  ;;  %576 = vbcast.lane.b32.xlu1 %v2715_v22, 272  ;;  %v159_v42 = vld [vmem:[%s3728_s0 + $0xc8] sm:$0xff]  ;;  %v160_v43 = vld [vmem:[%s3728_s0 + $0xd0] sm:$0xff]  ;;  %v161_v44 = vld [vmem:[%s3728_s0 + $0xd8] sm:$0xff]  ;;  %vm1333_vm12 = vcmask 720512   ;;  %vm3762_vm13 = vcmask 786112  }
  0x18   :  { %2233 = vmatprep.mubr.msk.f32.mxu1 %vm59_vm0, %v142_v28  ;;  %2277 = vmatprep.subr.mxu0 %v3740_v4  ;;  %v162_v45 = vld [vmem:[%s3728_s0 + $0xe0] sm:$0xff]  ;;  %v163_v46 = vld [vmem:[%s3728_s0 + $0xe8] sm:$0xff]  ;;  %v164_v47 = vld [vmem:[%s3728_s0 + $0xf0] sm:$0xff]  ;;  %vm3763_vm14 = vcmask 851712   ;;  %vm1354_vm15 = vcmask 917312   ;;  %vm1449_vm1 = vcmask 1041409  }
  0x19   :  { %2278 = vmatpush3.msra.mxu0 %v145_v32  ;;  %v165_v48 = vld [vmem:[%s3728_s0 + $0xf8] sm:$0xff]  ;;  %v167_v49 = vld [vmem:[%s3731_s3] sm:$0x3]  ;;  %s2567_s20 = smov [#allocation7]   ;;  %s2568_s22 = smov [#allocation11]  }
  0x1a   :  { %513 = vbcast.lane.b32.xlu0 %v2712_v21, 280  ;;  %2279 = vmatprep.subr.mxu0 %v3740_v4  ;;  %v2895_v50 = vrot.slane %v167_v49, %v2682_v15  ;;  %v2900_v51 = vrot.slane %v167_v49, %v2685_v16  ;;  %v2090_v7 = vld [vmem:[%s3734_s6] ss:$0 sm:$0xff]  ;;  %s2055_s21 = sshll.u32 %s2567_s20, 4  ;;  %s2075_s23 = sshll.u32 %s2568_s22, 4  ;;  %s2056_s21 = int_to_ptr.vmem [resolvable:$true] %s2055_s21  ;;  %s2076_s23 = int_to_ptr.vmem [resolvable:$true] %s2075_s23 }
  0x1b   :  { %2234 = vmatmul.mubr.msk.f32.gmra.mxu1 %vm59_vm0, %v143_v29  ;;  %580 = vbcast.lane.b32.xlu1 %v2715_v22, 280 }
  0x1c   :  { %2236 = vmatprep.mubr.msk.f32.mxu1 %vm59_vm0, %v144_v31  ;;  %2280 = vmatpush3.msra.mxu0 %v144_v31 }
  0x1d   :  { %2281 = vmatprep.subr.mxu0 %v3740_v4 }
  0x1e   :  { %517 = vbcast.lane.b32.xlu0 %v2712_v21, 288  ;;  %2282 = vmatpush3.msra.mxu0 %v143_v29  ;;  %v2950_v29 = vld [vmem:[%s3735_s7] ss:$0 sm:$0xff] }
  0x1f   :  { %2237 = vmatmul.mubr.msk.f32.gmra.mxu1 %vm59_vm0, %v145_v32  ;;  %584 = vbcast.lane.b32.xlu1 %v2715_v22, 288 }
  0x20   :  { %2239 = vmatprep.mubr.msk.f32.mxu1 %vm59_vm0, %v146_v30  ;;  %2283 = vmatprep.subr.mxu0 %v3740_v4 }
  0x21   :  { %2284 = vmatpush3.msra.mxu0 %v142_v28 }
  0x22   :  { %521 = vbcast.lane.b32.xlu0 %v2712_v21, 296  ;;  %2285 = vmatprep.subr.mxu0 %v3740_v4 }
  0x23   :  { %2240 = vmatmul.mubr.msk.f32.gmra.mxu1 %vm59_vm0, %v147_v27  ;;  %588 = vbcast.lane.b32.xlu1 %v2715_v22, 296 }
  0x24   :  { %2242 = vmatprep.mubr.msk.f32.mxu1 %vm59_vm0, %v148_v24  ;;  %2286 = vmatpush3.msra.mxu0 %v141_v26 }
  0x25   :  { %2287 = vmatprep.subr.mxu0 %v3740_v4 }
  0x26   :  { %525 = vbcast.lane.b32.xlu0 %v2712_v21, 304  ;;  %2288 = vmatpush3.msra.mxu0 %v2737_v25 }
  0x27   :  { %2243 = vmatmul.mubr.msk.f32.gmra.mxu1 %vm59_vm0, %v149_v18  ;;  %592 = vbcast.lane.b32.xlu1 %v2715_v22, 304 }
  0x28   :  { %2245 = vmatprep.mubr.msk.f32.mxu1 %vm59_vm0, %v150_v33  ;;  %2289 = vmatprep.subr.mxu0 %v3740_v4 }
  0x29   :  { %2290 = vmatpush3.msra.mxu0 %v2728_v23 }
  0x2a   :  { %529 = vbcast.lane.b32.xlu0 %v2712_v21, 312  ;;  %2291 = vmatprep.subr.mxu0 %v3740_v4 }
  0x2b   :  { %2246 = vmatmul.mubr.msk.f32.gmra.mxu1 %vm59_vm0, %v151_v34  ;;  %596 = vbcast.lane.b32.xlu1 %v2715_v22, 312 }
  0x2c   :  { %2248 = vmatprep.mubr.msk.f32.mxu1 %vm59_vm0, %v152_v35  ;;  %2292 = vmatpush3.msra.mxu0 %v2709_v20  ;;  %v680_v20 = vunpack.c.0.s8 %v679_v10 }
  0x2d   :  { %2293 = vmatprep.subr.mxu0 %v3740_v4 }
  0x2e   :  { %533 = vbcast.lane.b32.xlu0 %v2712_v21, 320  ;;  %2294 = vmatpush3.msra.mxu0 %v2697_v17  ;;  %v683_v24 = vsub.s32 %v680_v20, %v2654_v9 }
  0x2f   :  { %2249 = vmatmul.mubr.msk.f32.gmra.mxu1 %vm59_vm0, %v153_v36  ;;  %600 = vbcast.lane.b32.xlu1 %v2715_v22, 320 }
  0x30   :  { %2251 = vmatprep.mubr.msk.f32.mxu1 %vm59_vm0, %v154_v37  ;;  %2295 = vmatprep.subr.mxu0 %v3740_v4 }
  0x31   :  { %2296 = vmatpush3.msra.mxu0 %v2679_v14 }
  0x32   :  { %537 = vbcast.lane.b32.xlu0 %v2712_v21, 328  ;;  %2297 = vmatprep.subr.mxu0 %v3740_v4 }
  0x33   :  { %2252 = vmatmul.mubr.msk.f32.gmra.mxu1 %vm59_vm0, %v155_v38  ;;  %604 = vbcast.lane.b32.xlu1 %v2715_v22, 328 }
  0x34   :  { %2254 = vmatprep.mubr.msk.f32.mxu1 %vm59_vm0, %v156_v39  ;;  %2298 = vmatpush3.msra.mxu0 %v2672_v13 }
  0x35   :  { %2299 = vmatprep.subr.mxu0 %v3740_v4 }
  0x36   :  { %541 = vbcast.lane.b32.xlu0 %v2712_v21, 336  ;;  %2300 = vmatpush3.msra.mxu0 %v2663_v11 }
  0x37   :  { %2255 = vmatmul.mubr.msk.f32.gmra.mxu1 %vm59_vm0, %v157_v40  ;;  %608 = vbcast.lane.b32.xlu1 %v2715_v22, 336 }
  0x38   :  { %2257 = vmatprep.mubr.msk.f32.mxu1 %vm59_vm0, %v158_v41  ;;  %2304 = vmatprep.subr.mxu0 %v3740_v4 }
  0x3a   :  { %545 = vbcast.lane.b32.xlu0 %v2712_v21, 344 }
  0x3b   :  { %2258 = vmatmul.mubr.msk.f32.gmra.mxu1 %vm59_vm0, %v159_v42  ;;  %612 = vbcast.lane.b32.xlu1 %v2715_v22, 344 }
  0x3c   :  { %2260 = vmatprep.mubr.msk.f32.mxu1 %vm59_vm0, %v160_v43 }
  0x3e   :  { %549 = vbcast.lane.b32.xlu0 %v2712_v21, 352 }
  0x3f   :  { %2261 = vmatmul.mubr.msk.f32.gmra.mxu1 %vm59_vm0, %v161_v44  ;;  %616 = vbcast.lane.b32.xlu1 %v2715_v22, 352 }
  0x40   :  { %2263 = vmatprep.mubr.msk.f32.mxu1 %vm59_vm0, %v162_v45 }
  0x42   :  { %553 = vbcast.lane.b32.xlu0 %v2712_v21, 360 }
  0x43   :  { %2264 = vmatmul.mubr.msk.f32.gmra.mxu1 %vm59_vm0, %v163_v46  ;;  %620 = vbcast.lane.b32.xlu1 %v2715_v22, 360 }
  0x44   :  { %2266 = vmatprep.mubr.msk.f32.mxu1 %vm59_vm0, %v164_v47 }
  0x46   :  { %557 = vbcast.lane.b32.xlu0 %v2712_v21, 368 }
  0x47   :  { %2267 = vmatmul.mubr.msk.f32.gmra.mxu1 %vm59_vm0, %v165_v48  ;;  %624 = vbcast.lane.b32.xlu1 %v2715_v22, 368 }
  0x4a   :  { %561 = vbcast.lane.b32.xlu0 %v2712_v21, 376 }
  0x4b   :  { %628 = vbcast.lane.b32.xlu1 %v2715_v22, 376 }
  0x4e   :  { %942 = vbcast.lane.b32.xlu0 %v2895_v50, 264 }
  0x4f   :  { %938 = vbcast.lane.b32.xlu1 %v2895_v50, 256 }
  0x52   :  { %946 = vbcast.lane.b32.xlu0 %v2895_v50, 272 }
  0x53   :  { %1005 = vbcast.lane.b32.xlu1 %v2900_v51, 256 }
  0x56   :  { %950 = vbcast.lane.b32.xlu0 %v2895_v50, 280 }
  0x57   :  { %1009 = vbcast.lane.b32.xlu1 %v2900_v51, 264 }
  0x5a   :  { %954 = vbcast.lane.b32.xlu0 %v2895_v50, 288 }
  0x5b   :  { %1013 = vbcast.lane.b32.xlu1 %v2900_v51, 272 }
  0x5f   :  { %1017 = vbcast.lane.b32.xlu1 %v2900_v51, 280 }
  0x63   :  { %1021 = vbcast.lane.b32.xlu1 %v2900_v51, 288 }
  0x80   :  { %v502_v52 = vpop.permute.xlu0 %501  ;;  %v2912_v58 = vpop.permute.xlu1 %568 }
  0x81   :  { %v636_v35 = vmul.f32 %v2950_v29, %v502_v52 }
  0x84   :  { %v506_v53 = vpop.permute.xlu0 %505 }
  0x85   :  { %v2916_v60 = vpop.permute.xlu1 %572  ;;  %v637_v37 = vmul.f32 %v2950_v29, %v506_v53 }
  0x88   :  { %v510_v54 = vpop.permute.xlu0 %509 }
  0x89   :  { %v2920_v62 = vpop.permute.xlu1 %576  ;;  %v638_v41 = vmul.f32 %v2950_v29, %v510_v54 }
  0x8c   :  { %v514_v55 = vpop.permute.xlu0 %513 }
  0x8d   :  { %v2924_v0 = vpop.permute.xlu1 %580  ;;  %v639_v44 = vmul.f32 %v2950_v29, %v514_v55 }
  0x90   :  { %v518_v56 = vpop.permute.xlu0 %517 }
  0x91   :  { %v2928_v2 = vpop.permute.xlu1 %584  ;;  %v640_v54 = vmul.f32 %v2950_v29, %v518_v56 }
  0x94   :  { %v2910_v57 = vpop.permute.xlu0 %521 }
  0x95   :  { %v2932_v6 = vpop.permute.xlu1 %588 }
  0x98   :  { %v2914_v59 = vpop.permute.xlu0 %525 }
  0x99   :  { %v2939_v17 = vpop.permute.xlu1 %592 }
  0x9c   :  { %v2918_v61 = vpop.permute.xlu0 %529 }
  0x9d   :  { %v2945_v25 = vpop.permute.xlu1 %596 }
  0xa0   :  { %v2922_v63 = vpop.permute.xlu0 %533 }
  0xa1   :  { %v2957_v34 = vpop.permute.xlu1 %600 }
  0xa4   :  { %v2926_v1 = vpop.permute.xlu0 %537 }
  0xa8   :  { %v2930_v5 = vpop.permute.xlu0 %541 }
  0xac   :  { %v2937_v11 = vpop.permute.xlu0 %545 }
  0xb0   :  { %v2942_v23 = vpop.permute.xlu0 %549 }
  0xb4   :  { %v2952_v32 = vpop.permute.xlu0 %553 }
  0xb8   :  { %v558_v49 = vpop.permute.xlu0 %557 }
  0xca   :  { %v129_v12 = vpop.f32.mrf.mxu0 }
  0xcb   :  { %v2223_v13 = vpop.f32.mrf.mxu1  ;;  %v130_v14 = vadd.f32 %v2090_v7, %v129_v12  ;;  %v2970_v7 = vpop.permute.xlu1 %604 }
  0xcc   :  { %v2212_v18 = vpop.f32.mrf.mxu0 }
  0xcd   :  { %v337_v19 = vpop.f32.mrf.mxu1  ;;  %133 = vst.msk [vmem:[#allocation6] sm:$0x3] %vm3760_vm2, %v130_v14  ;;  %v562_v18 = vpop.permute.xlu0 %561  ;;  %vm1368_vm2 = vcmask 1048512  }
  0xcf   :  { %v2226_v21 = vpop.f32.mrf.mxu1  ;;  %v2982_v20 = vpop.permute.xlu1 %608 }
  0xd1   :  { %v347_v22 = vpop.f32.mrf.mxu1 }
  0xd3   :  { %v2229_v26 = vpop.f32.mrf.mxu1 }
  0xd4   :  { %v2125_v27 = vld.sshfl [vmem:[#allocation6] sm:$0x11 pattern:$0x75316420] }
  0xd5   :  { %v357_v28 = vpop.f32.mrf.mxu1  ;;  %v684_v30 = vrot.slane %v2125_v27, %v683_v24  ;;  %v677_v55 = vcombine.high %v2125_v27, %v2125_v27 }
  0xd7   :  { %v2232_v31 = vpop.f32.mrf.mxu1  ;;  %v2955_v33 = vrot.slane %v684_v30, %v2682_v15  ;;  %v691_v27 = vrot.slane %v677_v55, %v683_v24  ;;  %v3000_v24 = vld [vmem:[%s3736_s8] ss:$0 sm:$0xff] }
  0xd9   :  { %v367_v36 = vpop.f32.mrf.mxu1  ;;  %v703_v38 = vadd.f32 %v2223_v13, %v2955_v33  ;;  %v702_v39 = vadd.f32 %v2955_v33, %v337_v19  ;;  %v705_v40 = vadd.f32 %v2226_v21, %v2955_v33  ;;  %v704_v42 = vadd.f32 %v2955_v33, %v347_v22 }
  0xda   :  { %v706_v53 = vadd.f32 %v2955_v33, %v357_v28  ;;  %v707_v12 = vadd.f32 %v2229_v26, %v2955_v33  ;;  %v641_v19 = vmul.f32 %v2950_v29, %v2910_v57  ;;  %v642_v21 = vmul.f32 %v2950_v29, %v2914_v59 }
  0xdb   :  { %v2235_v43 = vpop.f32.mrf.mxu1  ;;  %v735_v45 = vadd.f32 %v703_v38, %v637_v37  ;;  %v734_v46 = vadd.f32 %v702_v39, %v636_v35  ;;  %v736_v47 = vadd.f32 %v704_v42, %v638_v41  ;;  %v737_v52 = vadd.f32 %v705_v40, %v639_v44 }
  0xdc   :  { %v738_v13 = vadd.f32 %v706_v53, %v640_v54  ;;  %v708_v56 = vadd.f32 %v2955_v33, %v367_v36  ;;  %v739_v28 = vadd.f32 %v707_v12, %v641_v19  ;;  %v651_v26 = vmul.f32 %v2950_v29, %v562_v18 }
  0xdd   :  { %v2967_v48 = vpop.f32.mrf.mxu1  ;;  %2349 = vtanh.f32 %v735_v45  ;;  %v650_v35 = vmul.f32 %v2950_v29, %v558_v49  ;;  %v643_v57 = vmul.f32 %v2950_v29, %v2918_v61  ;;  %v653_v59 = vmul.f32 %v2950_v29, %v2916_v60  ;;  %v3006_v61 = vpop.permute.xlu1 %612 }
  0xde   :  { %2351 = vtanh.f32 %v734_v46  ;;  %v709_v36 = vadd.f32 %v2232_v31, %v2955_v33  ;;  %v740_v38 = vadd.f32 %v708_v56, %v642_v21  ;;  %v3003_v40 = vrot.slane %v691_v27, %v2682_v15 }
  0xdf   :  { %v2972_v8 = vpop.f32.mrf.mxu1  ;;  %2353 = vtanh.f32 %v736_v47  ;;  %v652_v60 = vmul.f32 %v2950_v29, %v2912_v58  ;;  %v645_v31 = vmul.f32 %v2950_v29, %v2926_v1  ;;  %v711_v54 = vadd.f32 %v2235_v43, %v2955_v33 }
  0xe0   :  { %2355 = vtanh.f32 %v737_v52  ;;  %v741_v53 = vadd.f32 %v709_v36, %v643_v57  ;;  %v655_v21 = vmul.f32 %v2950_v29, %v2924_v0  ;;  %v710_v0 = vadd.f32 %v2955_v33, %v2967_v48 }
  0xe1   :  { %v2975_v10 = vpop.f32.mrf.mxu1  ;;  %2357 = vtanh.f32 %v738_v13 }
  0xe2   :  { %2359 = vtanh.f32 %v739_v28 }
  0xe3   :  { %v2978_v14 = vpop.f32.mrf.mxu1 }
  0xe5   :  { %v2987_v22 = vpop.f32.mrf.mxu1 }
  0xe7   :  { %v2244_v30 = vpop.f32.mrf.mxu1 }
  0xe8   :  { %v717_v37 = vadd.f32 %v2244_v30, %v2955_v33  ;;  %v3023_v30 = vpop.permute.xlu1 %616 }
  0xe9   :  { %v407_v39 = vpop.f32.mrf.mxu1 }
  0xea   :  { %v749_v41 = vadd.f32 %v717_v37, %v651_v26  ;;  %v716_v42 = vadd.f32 %v2955_v33, %v407_v39  ;;  %v2350_v44 = vpop.eup %2349  ;;  %v743_v37 = vadd.f32 %v711_v54, %v645_v31 }
  0xeb   :  { %v2247_v45 = vpop.f32.mrf.mxu1  ;;  %v2352_v46 = vpop.eup %2351  ;;  %v805_v52 = vmul.f32 %v2350_v44, %v3000_v24  ;;  %v647_v44 = vmul.f32 %v2950_v29, %v2937_v11 }
  0xec   :  { %2361 = vtanh.f32 %v749_v41  ;;  %v748_v47 = vadd.f32 %v716_v42, %v650_v35  ;;  %v719_v49 = vadd.f32 %v2247_v45, %v3003_v40  ;;  %v804_v12 = vmul.f32 %v2352_v46, %v3000_v24  ;;  %v2354_v13 = vpop.eup %2353 }
  0xed   :  { %2363 = vtanh.f32 %v740_v38  ;;  %v417_v55 = vpop.f32.mrf.mxu1  ;;  %v839_v18 = vsel %vm59_vm0, %v805_v52, 0.0  ;;  %v2356_v19 = vpop.eup %2355  ;;  %v806_v43 = vmul.f32 %v2354_v13, %v3000_v24  ;;  %v644_v35 = vmul.f32 %v2950_v29, %v2922_v63 }
  0xee   :  { %2365 = vtanh.f32 %v748_v47  ;;  %v751_v58 = vadd.f32 %v719_v49, %v653_v59  ;;  %v718_v1 = vadd.f32 %v3003_v40, %v417_v55  ;;  %840 = vadd.xlane.f32.xlu1 %v839_v18  ;;  %v836_v27 = vsel %vm59_vm0, %v804_v12, 0.0  ;;  %v2358_v38 = vpop.eup %2357  ;;  %v621_v47 = vpop.permute.xlu1 %620 }
  0xef   :  { %v2250_v56 = vpop.f32.mrf.mxu1  ;;  %837 = vadd.xlane.f32.xlu0 %v836_v27  ;;  %v842_v59 = vsel %vm59_vm0, %v806_v43, 0.0  ;;  %v807_v36 = vmul.f32 %v2356_v19, %v3000_v24  ;;  %v654_v42 = vmul.f32 %v2950_v29, %v2920_v62  ;;  %v742_v48 = vadd.f32 %v710_v0, %v644_v35  ;;  %v2360_v49 = vpop.eup %2359 }
  0xf0   :  { %2367 = vtanh.f32 %v751_v58  ;;  %v750_v28 = vadd.f32 %v718_v1, %v652_v60  ;;  %v721_v26 = vadd.f32 %v2250_v56, %v3003_v40  ;;  %v713_v60 = vadd.f32 %v2972_v8, %v2955_v33 }
  0xf1   :  { %v427_v57 = vpop.f32.mrf.mxu1  ;;  %2369 = vtanh.f32 %v741_v53  ;;  %v845_v45 = vsel %vm59_vm0, %v807_v36, 0.0  ;;  %v808_v46 = vmul.f32 %v2358_v38, %v3000_v24  ;;  %v657_v52 = vmul.f32 %v2950_v29, %v2932_v6 }
  0xf2   :  { %v753_v39 = vadd.f32 %v721_v26, %v655_v21  ;;  %843 = vadd.xlane.f32.xlu1 %v842_v59  ;;  %2371 = vtanh.f32 %v750_v28  ;;  %v720_v63 = vadd.f32 %v3003_v40, %v427_v57  ;;  %v646_v8 = vmul.f32 %v2950_v29, %v2930_v5  ;;  %v625_v28 = vpop.permute.xlu1 %624 }
  0xf3   :  { %v2253_v41 = vpop.f32.mrf.mxu1  ;;  %2373 = vtanh.f32 %v743_v37  ;;  %v745_v55 = vadd.f32 %v713_v60, %v647_v44  ;;  %v712_v58 = vadd.f32 %v2955_v33, %v2975_v10  ;;  %v848_v1 = vsel %vm59_vm0, %v808_v46, 0.0 }
  0xf4   :  { %2375 = vtanh.f32 %v753_v39  ;;  %v752_v53 = vadd.f32 %v720_v63, %v654_v42  ;;  %v723_v11 = vadd.f32 %v2253_v41, %v3003_v40  ;;  %v809_v6 = vmul.f32 %v2360_v49, %v3000_v24 }
  0xf5   :  { %v437_v31 = vpop.f32.mrf.mxu1  ;;  %2377 = vtanh.f32 %v742_v48  ;;  %v656_v21 = vmul.f32 %v2950_v29, %v2928_v2  ;;  %v3057_v27 = vmul.f32 %v2950_v29, %v2939_v17  ;;  %v2564_v26 = vmov 0  }
  0xf6   :  { %846 = vadd.xlane.f32.xlu1 %v845_v45  ;;  %v722_v56 = vadd.f32 %v3003_v40, %v437_v31  ;;  %2379 = vtanh.f32 %v752_v53  ;;  %v755_v10 = vadd.f32 %v723_v11, %v657_v52  ;;  %2347 = vset.pattern.permute.xlu0 %v2564_v26  ;;  %v649_v2 = vmul.f32 %v2950_v29, %v2952_v32  ;;  %v629_v52 = vpop.permute.xlu1 %628 }
  0xf7   :  { %v2256_v62 = vpop.f32.mrf.mxu1  ;;  %2348 = vset.pattern.permute.xlu1 %v2564_v26  ;;  %v715_v37 = vadd.f32 %v2978_v14, %v2955_v33  ;;  %v659_v0 = vmul.f32 %v2950_v29, %v2945_v25  ;;  %2381 = vtanh.f32 %v745_v55  ;;  %v744_v59 = vadd.f32 %v712_v58, %v646_v8 }
  0xf8   :  { %v851_v36 = vsel %vm59_vm0, %v809_v6, 0.0  ;;  %v3073_v32 = vmul.f32 %v2950_v29, %v2970_v7  ;;  %v662_v14 = vmul.f32 %v2950_v29, %v2982_v20  ;;  %v754_v25 = vadd.f32 %v722_v56, %v656_v21 }
  0xf9   :  { %v2362_v54 = vpop.eup %2361  ;;  %v447_v12 = vpop.f32.mrf.mxu1  ;;  %v725_v41 = vadd.f32 %v2256_v62, %v3003_v40  ;;  %v648_v63 = vmul.f32 %v2950_v29, %v2942_v23  ;;  %2383 = vtanh.f32 %v755_v10  ;;  %v747_v7 = vadd.f32 %v715_v37, %v649_v2 }
  0xfa   :  { %v2364_v13 = vpop.eup %2363  ;;  %v819_v18 = vmul.f32 %v2362_v54, %v3000_v24  ;;  %849 = vadd.xlane.f32.xlu1 %v848_v1  ;;  %v714_v31 = vadd.f32 %v2955_v33, %v2987_v22  ;;  %v664_v20 = vmul.f32 %v2950_v29, %v3023_v30  ;;  %v665_v45 = vmul.f32 %v2950_v29, %v621_v47 }
  0xfb   :  { %v2366_v19 = vpop.eup %2365  ;;  %v3053_v5 = vpop.f32.mrf.mxu1  ;;  %v810_v38 = vmul.f32 %v2364_v13, %v3000_v24  ;;  %2385 = vtanh.f32 %v744_v59  ;;  %v757_v11 = vadd.f32 %v725_v41, %v659_v0  ;;  %v724_v33 = vadd.f32 %v3003_v40, %v447_v12 }
  0xfc   :  { %v881_v43 = vsel %vm59_vm0, %v819_v18, 0.0  ;;  %v818_v57 = vmul.f32 %v2366_v19, %v3000_v24  ;;  %2387 = vtanh.f32 %v754_v25  ;;  %v666_v22 = vmul.f32 %v2950_v29, %v625_v28 }
  0xfd   :  { %v2368_v35 = vpop.eup %2367  ;;  %v3066_v17 = vpop.f32.mrf.mxu1  ;;  %882 = vadd.xlane.f32.xlu0 %v881_v43  ;;  %v854_v62 = vsel %vm59_vm0, %v810_v38, 0.0  ;;  %2389 = vtanh.f32 %v747_v7  ;;  %v746_v58 = vadd.f32 %v714_v31, %v648_v63  ;;  %v667_v18 = vmul.f32 %v2950_v29, %v629_v52 }
  0xfe   :  { %v2370_v39 = vpop.eup %2369  ;;  %852 = vadd.xlane.f32.xlu1 %v851_v36  ;;  %v878_v44 = vsel %vm59_vm0, %v818_v57, 0.0  ;;  %v821_v48 = vmul.f32 %v2368_v35, %v3000_v24  ;;  %v756_v10 = vadd.f32 %v724_v33, %v3057_v27  ;;  %v727_v43 = vadd.f32 %v3053_v5, %v3003_v40 }
  0xff   :  { %v3078_v42 = vpop.f32.mrf.mxu1  ;;  %v2372_v60 = vpop.eup %2371  ;;  %v811_v53 = vmul.f32 %v2370_v39, %v3000_v24  ;;  %v660_v39 = vmul.f32 %v2950_v29, %v2957_v34  ;;  %v726_v25 = vadd.f32 %v3003_v40, %v3066_v17 }
 0x100   :  { %v2374_v49 = vpop.eup %2373  ;;  %v887_v55 = vsel %vm59_vm0, %v821_v48, 0.0  ;;  %v820_v13 = vmul.f32 %v2372_v60, %v3000_v24 }
 0x101   :  { %v467_v46 = vpop.f32.mrf.mxu1  ;;  %879 = vadd.xlane.f32.xlu0 %v878_v44  ;;  %v2376_v47 = vpop.eup %2375  ;;  %v813_v12 = vmul.f32 %v2374_v49, %v3000_v24  ;;  %v857_v56 = vsel %vm59_vm0, %v811_v53, 0.0  ;;  %v758_v31 = vadd.f32 %v726_v25, %v660_v39 }
 0x102   :  { %v728_v23 = vadd.f32 %v3003_v40, %v467_v46  ;;  %855 = vadd.xlane.f32.xlu1 %v854_v62  ;;  %v2378_v6 = vpop.eup %2377  ;;  %v823_v26 = vmul.f32 %v2376_v47, %v3000_v24  ;;  %v884_v37 = vsel %vm59_vm0, %v820_v13, 0.0 }
 0x103   :  { %v2265_v30 = vpop.f32.mrf.mxu1  ;;  %v2380_v0 = vpop.eup %2379  ;;  %v812_v59 = vmul.f32 %v2378_v6, %v3000_v24  ;;  %v863_v36 = vsel %vm59_vm0, %v813_v12, 0.0 }
 0x104   :  { %v760_v54 = vadd.f32 %v728_v23, %v662_v14  ;;  %v731_v8 = vadd.f32 %v2265_v30, %v3003_v40  ;;  %v2382_v38 = vpop.eup %2381  ;;  %v759_v14 = vadd.f32 %v727_v43, %v3073_v32  ;;  %v893_v63 = vsel %vm59_vm0, %v823_v26, 0.0 }
 0x105   :  { %v477_v1 = vpop.f32.mrf.mxu1  ;;  %888 = vadd.xlane.f32.xlu0 %v887_v55  ;;  %v822_v44 = vmul.f32 %v2380_v0, %v3000_v24  ;;  %v860_v60 = vsel %vm59_vm0, %v812_v59, 0.0  ;;  %v815_v34 = vmul.f32 %v2382_v38, %v3000_v24  ;;  %v663_v32 = vmul.f32 %v2950_v29, %v3006_v61 }
 0x106   :  { %2391 = vtanh.f32 %v760_v54  ;;  %v763_v19 = vadd.f32 %v731_v8, %v665_v45  ;;  %v730_v21 = vadd.f32 %v3003_v40, %v477_v1  ;;  %858 = vadd.xlane.f32.xlu1 %v857_v56  ;;  %v2384_v48 = vpop.eup %2383 }
 0x107   :  { %2393 = vtanh.f32 %v757_v11  ;;  %v2268_v28 = vpop.f32.mrf.mxu1  ;;  %v890_v45 = vsel %vm59_vm0, %v822_v44, 0.0  ;;  %v825_v46 = vmul.f32 %v2384_v48, %v3000_v24  ;;  %v869_v23 = vsel %vm59_vm0, %v815_v34, 0.0  ;;  %v943_v44 = vpop.permute.xlu0 %942 }
 0x108   :  { %2395 = vtanh.f32 %v763_v19  ;;  %v762_v35 = vadd.f32 %v730_v21, %v664_v20  ;;  %v733_v2 = vadd.f32 %v2268_v28, %v3003_v40  ;;  %v2386_v7 = vpop.eup %2385  ;;  %v729_v20 = vadd.f32 %v3078_v42, %v3003_v40 }
 0x109   :  { %2397 = vtanh.f32 %v746_v58  ;;  %v487_v57 = vpop.f32.mrf.mxu1  ;;  %885 = vadd.xlane.f32.xlu0 %v884_v37  ;;  %v2388_v17 = vpop.eup %2387  ;;  %v814_v62 = vmul.f32 %v2386_v7, %v3000_v24  ;;  %v899_v53 = vsel %vm59_vm0, %v825_v46, 0.0 }
 0x10a   :  { %2399 = vtanh.f32 %v762_v35  ;;  %v765_v27 = vadd.f32 %v733_v2, %v667_v18  ;;  %v732_v5 = vadd.f32 %v3003_v40, %v487_v57  ;;  %864 = vadd.xlane.f32.xlu1 %v863_v36  ;;  %v2390_v49 = vpop.eup %2389  ;;  %v761_v61 = vadd.f32 %v729_v20, %v663_v32 }
 0x10b   :  { %2401 = vtanh.f32 %v756_v10  ;;  %v824_v11 = vmul.f32 %v2388_v17, %v3000_v24  ;;  %v817_v30 = vmul.f32 %v2390_v49, %v3000_v24 }
 0x10c   :  { %2403 = vtanh.f32 %v765_v27  ;;  %v764_v41 = vadd.f32 %v732_v5, %v666_v22  ;;  %v866_v22 = vsel %vm59_vm0, %v814_v62, 0.0 }
 0x10d   :  { %894 = vadd.xlane.f32.xlu0 %v893_v63  ;;  %v896_v55 = vsel %vm59_vm0, %v824_v11, 0.0  ;;  %v875_v18 = vsel %vm59_vm0, %v817_v30, 0.0 }
 0x10e   :  { %2405 = vtanh.f32 %v764_v41  ;;  %861 = vadd.xlane.f32.xlu1 %v860_v60  ;;  %v947_v60 = vpop.permute.xlu0 %946 }
 0x10f   :  { %2407 = vtanh.f32 %v759_v14  ;;  %v939_v14 = vpop.permute.xlu1 %938 }
 0x110   :  { %2409 = vtanh.f32 %v758_v31 }
 0x111   :  { %891 = vadd.xlane.f32.xlu0 %v890_v45  ;;  %2411 = vtanh.f32 %v761_v61 }
 0x112   :  { %870 = vadd.xlane.f32.xlu1 %v869_v23  ;;  %v951_v7 = vpop.permute.xlu0 %950 }
 0x113   :  { %v2392_v52 = vpop.eup %2391  ;;  %v3160_v41 = vpop.permute.xlu1 %1005 }
 0x114   :  { %v2394_v29 = vpop.eup %2393  ;;  %v830_v40 = vmul.f32 %v2392_v52, %v3000_v24 }
 0x115   :  { %v2396_v42 = vpop.eup %2395  ;;  %900 = vadd.xlane.f32.xlu0 %v899_v53  ;;  %v827_v13 = vmul.f32 %v2394_v29, %v3000_v24 }
 0x116   :  { %v2398_v33 = vpop.eup %2397  ;;  %v833_v47 = vmul.f32 %v2396_v42, %v3000_v24  ;;  %867 = vadd.xlane.f32.xlu1 %v866_v22  ;;  %v914_v36 = vsel %vm59_vm0, %v830_v40, 0.0  ;;  %v955_v31 = vpop.permute.xlu0 %954 }
 0x117   :  { %v2400_v54 = vpop.eup %2399  ;;  %v816_v12 = vmul.f32 %v2398_v33, %v3000_v24  ;;  %v905_v21 = vsel %vm59_vm0, %v827_v13, 0.0  ;;  %v1010_v63 = vpop.permute.xlu1 %1009 }
 0x118   :  { %v2402_v8 = vpop.eup %2401  ;;  %v832_v58 = vmul.f32 %v2400_v54, %v3000_v24  ;;  %v923_v38 = vsel %vm59_vm0, %v833_v47, 0.0 }
 0x119   :  { %v2404_v1 = vpop.eup %2403  ;;  %897 = vadd.xlane.f32.xlu0 %v896_v55  ;;  %v826_v56 = vmul.f32 %v2402_v8, %v3000_v24  ;;  %v872_v28 = vsel %vm59_vm0, %v816_v12, 0.0 }
 0x11a   :  { %v835_v6 = vmul.f32 %v2404_v1, %v3000_v24  ;;  %876 = vadd.xlane.f32.xlu1 %v875_v18  ;;  %v920_v39 = vsel %vm59_vm0, %v832_v58, 0.0 }
 0x11b   :  { %v2406_v19 = vpop.eup %2405  ;;  %v902_v35 = vsel %vm59_vm0, %v826_v56, 0.0  ;;  %v1014_v48 = vpop.permute.xlu1 %1013 }
 0x11c   :  { %v834_v10 = vmul.f32 %v2406_v19, %v3000_v24  ;;  %v2408_v43 = vpop.eup %2407 }
 0x11d   :  { %906 = vadd.xlane.f32.xlu0 %v905_v21  ;;  %v2410_v26 = vpop.eup %2409  ;;  %v829_v2 = vmul.f32 %v2408_v43, %v3000_v24 }
 0x11e   :  { %873 = vadd.xlane.f32.xlu1 %v872_v28  ;;  %v828_v0 = vmul.f32 %v2410_v26, %v3000_v24  ;;  %v2412_v57 = vpop.eup %2411  ;;  %v926_v25 = vsel %vm59_vm0, %v834_v10, 0.0 }
 0x11f   :  { %v911_v37 = vsel %vm59_vm0, %v829_v2, 0.0  ;;  %v831_v27 = vmul.f32 %v2412_v57, %v3000_v24  ;;  %v929_v24 = vsel %vm59_vm0, %v835_v6, 0.0  ;;  %v1018_v34 = vpop.permute.xlu1 %1017 }
 0x120   :  { %v908_v59 = vsel %vm59_vm0, %v828_v0, 0.0 }
 0x121   :  { %903 = vadd.xlane.f32.xlu0 %v902_v35  ;;  %v917_v5 = vsel %vm59_vm0, %v831_v27, 0.0  ;;  %vm1361_vm0 = vcmask 982912  }
 0x123   :  { %v1022_v32 = vpop.permute.xlu1 %1021 }
 0x125   :  { %912 = vadd.xlane.f32.xlu0 %v911_v37 }
 0x129   :  { %909 = vadd.xlane.f32.xlu0 %v908_v59 }
 0x12d   :  { %918 = vadd.xlane.f32.xlu0 %v917_v5 }
 0x12f   :  { %1025 = vbcast.lane.b32.xlu1 %v2900_v51, 296 }
 0x131   :  { %915 = vadd.xlane.f32.xlu0 %v914_v36 }
 0x135   :  { %924 = vadd.xlane.f32.xlu0 %v923_v38 }
 0x139   :  { %921 = vadd.xlane.f32.xlu0 %v920_v39 }
 0x14f   :  { %958 = vbcast.lane.b32.xlu0 %v2895_v50, 296 }
 0x153   :  { %962 = vbcast.lane.b32.xlu0 %v2895_v50, 304  ;;  %930 = vadd.xlane.f32.xlu1 %v929_v24 }
 0x157   :  { %966 = vbcast.lane.b32.xlu0 %v2895_v50, 312  ;;  %927 = vadd.xlane.f32.xlu1 %v926_v25 }
 0x15b   :  { %970 = vbcast.lane.b32.xlu0 %v2895_v50, 320 }
 0x15f   :  { %974 = vbcast.lane.b32.xlu0 %v2895_v50, 328 }
 0x163   :  { %978 = vbcast.lane.b32.xlu0 %v2895_v50, 336 }
 0x167   :  { %982 = vbcast.lane.b32.xlu0 %v2895_v50, 344 }
 0x168   :  { %1029 = vbcast.lane.b32.xlu1 %v2900_v51, 304 }
 0x16b   :  { %986 = vbcast.lane.b32.xlu0 %v2895_v50, 352 }
 0x16c   :  { %1033 = vbcast.lane.b32.xlu1 %v2900_v51, 312 }
 0x16f   :  { %990 = vbcast.lane.b32.xlu0 %v2895_v50, 360 }
 0x170   :  { %1037 = vbcast.lane.b32.xlu1 %v2900_v51, 320 }
 0x173   :  { %994 = vbcast.lane.b32.xlu0 %v2895_v50, 368 }
 0x174   :  { %1041 = vbcast.lane.b32.xlu1 %v2900_v51, 328 }
 0x177   :  { %998 = vbcast.lane.b32.xlu0 %v2895_v50, 376  ;;  %v841_v17 = vpop.xlane.xlu1 %840 }
 0x178   :  { %v838_v20 = vpop.xlane.xlu0 %837  ;;  %1045 = vbcast.lane.b32.xlu1 %v2900_v51, 336  ;;  %v3186_v53 = vadd.f32 %v943_v44, %v841_v17 }
 0x179   :  { %v3174_v45 = vadd.f32 %v939_v14, %v838_v20 }
 0x17b   :  { %1164 = vperm.xlu0 %2347, %v3174_v45   ;;  %v844_v46 = vpop.xlane.xlu1 %843 }
 0x17c   :  { %1049 = vbcast.lane.b32.xlu1 %v2900_v51, 344  ;;  %v3192_v33 = vadd.f32 %v947_v60, %v844_v46 }
 0x17f   :  { %v847_v49 = vpop.xlane.xlu1 %846 }
 0x180   :  { %1053 = vbcast.lane.b32.xlu1 %v2900_v51, 352  ;;  %v3195_v47 = vadd.f32 %v951_v7, %v847_v49 }
 0x183   :  { %v850_v23 = vpop.xlane.xlu1 %849 }
 0x184   :  { %1057 = vbcast.lane.b32.xlu1 %v2900_v51, 360  ;;  %v3201_v55 = vadd.f32 %v955_v31, %v850_v23 }
 0x186   :  { %v3180_v62 = vpop.xlane.xlu0 %882 }
 0x187   :  { %v853_v50 = vpop.xlane.xlu1 %852 }
 0x188   :  { %1061 = vbcast.lane.b32.xlu1 %v2900_v51, 368 }
 0x18a   :  { %v3183_v52 = vpop.xlane.xlu0 %879 }
 0x18b   :  { %v856_v29 = vpop.xlane.xlu1 %855 }
 0x18c   :  { %1065 = vbcast.lane.b32.xlu1 %v2900_v51, 376 }
 0x18e   :  { %v889_v61 = vpop.xlane.xlu0 %888 }
 0x18f   :  { %v3188_v11 = vadd.f32 %v1010_v63, %v889_v61  ;;  %v859_v40 = vpop.xlane.xlu1 %858 }
 0x190   :  { %1167 = vperm.xlu1 %2348, %v3186_v53  }
 0x191   :  { %1215 = vperm.xlu0 %2347, %v3188_v11  }
 0x192   :  { %v886_v42 = vpop.xlane.xlu0 %885 }
 0x193   :  { %v865_v22 = vpop.xlane.xlu1 %864  ;;  %v3235_v20 = vadd.f32 %v3160_v41, %v886_v42 }
 0x194   :  { %1170 = vperm.xlu1 %2348, %v3192_v33  }
 0x195   :  { %3768 = vst [vmem:[#allocation16_spill] sm:$0xff] %v3235_v20 }
 0x196   :  { %v895_v30 = vpop.xlane.xlu0 %894 }
 0x197   :  { %v3197_v51 = vadd.f32 %v1018_v34, %v895_v30  ;;  %v862_v54 = vpop.xlane.xlu1 %861 }
 0x198   :  { %1173 = vperm.xlu1 %2348, %v3195_v47  }
 0x199   :  { %1221 = vperm.xlu0 %2347, %v3197_v51  }
 0x19a   :  { %v892_v8 = vpop.xlane.xlu0 %891 }
 0x19b   :  { %v3203_v13 = vadd.f32 %v1014_v48, %v892_v8  ;;  %v871_v58 = vpop.xlane.xlu1 %870 }
 0x19c   :  { %1176 = vperm.xlu1 %2348, %v3201_v55  }
 0x19d   :  { %3766 = vst [vmem:[#allocation14_spill] sm:$0xff] %v3203_v13  ;;  %1218 = vperm.xlu0 %2347, %v3203_v13  }
 0x19e   :  { %v901_v1 = vpop.xlane.xlu0 %900 }
 0x19f   :  { %v868_v18 = vpop.xlane.xlu1 %867 }
 0x1a2   :  { %v898_v12 = vpop.xlane.xlu0 %897 }
 0x1a3   :  { %v877_v6 = vpop.xlane.xlu1 %876  ;;  %v3210_v26 = vadd.f32 %v1022_v32, %v898_v12 }
 0x1a5   :  { %3767 = vst [vmem:[#allocation15_spill] sm:$0xff] %v3210_v26 }
 0x1a6   :  { %v907_v19 = vpop.xlane.xlu0 %906 }
 0x1a7   :  { %v874_v21 = vpop.xlane.xlu1 %873 }
 0x1aa   :  { %v904_v56 = vpop.xlane.xlu0 %903 }
 0x1ab   :  { %v1026_v10 = vpop.permute.xlu1 %1025 }
 0x1ac   :  { %v3207_v43 = vadd.f32 %v1026_v10, %v901_v1 }
 0x1ae   :  { %v913_v28 = vpop.xlane.xlu0 %912  ;;  %1227 = vperm.xlu0 %2347, %v3207_v43  }
 0x1b2   :  { %v910_v35 = vpop.xlane.xlu0 %909  ;;  %1224 = vperm.xlu0 %2347, %v3210_v26  }
 0x1b6   :  { %v919_v2 = vpop.xlane.xlu0 %918 }
 0x1ba   :  { %v916_v37 = vpop.xlane.xlu0 %915 }
 0x1be   :  { %v925_v0 = vpop.xlane.xlu0 %924 }
 0x1c2   :  { %v922_v57 = vpop.xlane.xlu0 %921 }
 0x1c6   :  { %v959_v59 = vpop.permute.xlu0 %958 }
 0x1c7   :  { %v3213_v27 = vadd.f32 %v959_v59, %v853_v50 }
 0x1c9   :  { %1179 = vperm.xlu1 %2348, %v3213_v27  }
 0x1ca   :  { %v963_v5 = vpop.permute.xlu0 %962 }
 0x1cb   :  { %v3216_v36 = vadd.f32 %v963_v5, %v856_v29 }
 0x1cd   :  { %1182 = vperm.xlu1 %2348, %v3216_v36  }
 0x1ce   :  { %v967_v38 = vpop.permute.xlu0 %966 }
 0x1cf   :  { %v3219_v39 = vadd.f32 %v967_v38, %v859_v40 }
 0x1d1   :  { %1185 = vperm.xlu1 %2348, %v3219_v39  }
 0x1d2   :  { %v971_v24 = vpop.permute.xlu0 %970 }
 0x1d3   :  { %v3225_v44 = vadd.f32 %v971_v24, %v862_v54 }
 0x1d6   :  { %v975_v14 = vpop.permute.xlu0 %974 }
 0x1d7   :  { %v3222_v25 = vadd.f32 %v975_v14, %v865_v22 }
 0x1d9   :  { %1191 = vperm.xlu1 %2348, %v3222_v25  }
 0x1da   :  { %v979_v63 = vpop.permute.xlu0 %978 }
 0x1db   :  { %v3231_v31 = vadd.f32 %v979_v63, %v868_v18 }
 0x1dc   :  { %v931_v48 = vpop.xlane.xlu1 %930 }
 0x1dd   :  { %1188 = vperm.xlu1 %2348, %v3225_v44  }
 0x1de   :  { %v983_v60 = vpop.permute.xlu0 %982 }
 0x1df   :  { %v3228_v34 = vadd.f32 %v983_v60, %v871_v58 }
 0x1e0   :  { %v928_v7 = vpop.xlane.xlu1 %927 }
 0x1e1   :  { %1197 = vperm.xlu1 %2348, %v3228_v34  }
 0x1e2   :  { %v987_v32 = vpop.permute.xlu0 %986 }
 0x1e3   :  { %v3240_v50 = vadd.f32 %v987_v32, %v874_v21 }
 0x1e4   :  { %v1030_v17 = vpop.permute.xlu1 %1029 }
 0x1e5   :  { %1194 = vperm.xlu1 %2348, %v3231_v31   ;;  %3769 = vst [vmem:[#allocation17_spill] sm:$0xff] %v3240_v50  ;;  %v3244_v61 = vadd.f32 %v1030_v17, %v904_v56 }
 0x1e6   :  { %v991_v46 = vpop.permute.xlu0 %990 }
 0x1e7   :  { %3770 = vst [vmem:[#allocation18_spill] sm:$0xff] %v3244_v61  ;;  %v3246_v22 = vadd.f32 %v991_v46, %v877_v6 }
 0x1e8   :  { %v1034_v49 = vpop.permute.xlu1 %1033 }
 0x1e9   :  { %1212 = vperm.xlu1 %2348, %v3235_v20   ;;  %v3238_v23 = vadd.f32 %v1034_v49, %v907_v19 }
 0x1ea   :  { %v995_v40 = vpop.permute.xlu0 %994 }
 0x1eb   :  { %1233 = vperm.xlu0 %2347, %v3238_v23   ;;  %v3253_v30 = vadd.f32 %v995_v40, %v3183_v52 }
 0x1ec   :  { %v1038_v29 = vpop.permute.xlu1 %1037 }
 0x1ed   :  { %1200 = vperm.xlu1 %2348, %v3240_v50   ;;  %3771 = vst [vmem:[#allocation19_spill] sm:$0xff] %v3253_v30  ;;  %v3257_v58 = vadd.f32 %v1038_v29, %v910_v35  ;;  %v3307_v29 = vand.u32 127, %v496_v3 }
 0x1ee   :  { %v999_v54 = vpop.permute.xlu0 %998 }
 0x1ef   :  { %1230 = vperm.xlu0 %2347, %v3244_v61   ;;  %3772 = vst [vmem:[#allocation20_spill] sm:$0xff] %v3257_v58  ;;  %v3260_v1 = vadd.f32 %v999_v54, %v3180_v62  ;;  %v1265_v40 = vadd.s32 4294967288, %v3307_v29 }
 0x1f0   :  { %v1042_v41 = vpop.permute.xlu1 %1041 }
 0x1f1   :  { %1203 = vperm.xlu1 %2348, %v3246_v22   ;;  %v3250_v42 = vadd.f32 %v1042_v41, %v913_v28 }
 0x1f3   :  { %1239 = vperm.xlu0 %2347, %v3250_v42  }
 0x1f4   :  { %v1046_v8 = vpop.permute.xlu1 %1045 }
 0x1f5   :  { %1206 = vperm.xlu1 %2348, %v3253_v30   ;;  %v3267_v6 = vadd.f32 %v1046_v8, %v916_v37  ;;  %v3314_v8 = vsub.s32 %v3307_v29, %v2654_v9 }
 0x1f6   :  { %v3294_v38 = vpop.permute.xlu0 %1164 }
 0x1f7   :  { %1236 = vperm.xlu0 %2347, %v3257_v58   ;;  %3773 = vst [vmem:[#allocation21_spill] sm:$0xff] %v3267_v6  ;;  %3776 = vst [vmem:[#allocation24_spill] sm:$0xff] %v3314_v8  ;;  %v1286_v58 = vadd.s32 4294967264, %v3307_v29 }
 0x1f8   :  { %v1050_v18 = vpop.permute.xlu1 %1049 }
 0x1f9   :  { %1209 = vperm.xlu1 %2348, %v3260_v1   ;;  %v3264_v12 = vadd.f32 %v1050_v18, %v919_v2  ;;  %v3317_v18 = vsub.s32 %v1265_v40, %v2654_v9 }
 0x1fb   :  { %1245 = vperm.xlu0 %2347, %v3264_v12   ;;  %3777 = vst [vmem:[#allocation25_spill] sm:$0xff] %v3317_v18 }
 0x1fc   :  { %v1054_v52 = vpop.permute.xlu1 %1053 }
 0x1fd   :  { %v3273_v56 = vadd.f32 %v1054_v52, %v922_v57  ;;  %v1272_v52 = vadd.s32 4294967280, %v3307_v29 }
 0x1ff   :  { %1242 = vperm.xlu0 %2347, %v3267_v6   ;;  %3774 = vst [vmem:[#allocation22_spill] sm:$0xff] %v3273_v56  ;;  %v3324_v4 = vsub.s32 %v1272_v52, %v2654_v9 }
 0x200   :  { %v1058_v19 = vpop.permute.xlu1 %1057 }
 0x201   :  { %v3270_v21 = vadd.f32 %v1058_v19, %v925_v0 }
 0x203   :  { %1251 = vperm.xlu0 %2347, %v3270_v21  }
 0x204   :  { %v1062_v62 = vpop.permute.xlu1 %1061 }
 0x205   :  { %v3276_v10 = vadd.f32 %v1062_v62, %v928_v7  ;;  %v1279_v62 = vadd.s32 4294967272, %v3307_v29 }
 0x207   :  { %1248 = vperm.xlu0 %2347, %v3273_v56   ;;  %3775 = vst [vmem:[#allocation23_spill] sm:$0xff] %v3276_v10  ;;  %v3329_v56 = vsub.s32 %v1279_v62, %v2654_v9  ;;  %v3339_v62 = vsub.s32 %v1286_v58, %v2654_v9 }
 0x208   :  { %v1066_v28 = vpop.permute.xlu1 %1065 }
 0x209   :  { %v3279_v35 = vadd.f32 %v1066_v28, %v931_v48  ;;  %3778 = vst [vmem:[#allocation26_spill] sm:$0xff] %v3329_v56  ;;  %3779 = vst [vmem:[#allocation27_spill] sm:$0xff] %v3339_v62 }
 0x20b   :  { %1254 = vperm.xlu0 %2347, %v3276_v10  }
 0x20c   :  { %v3282_v2 = vpop.permute.xlu1 %1167  ;;  %v1216_v24 = vpop.permute.xlu0 %1215 }
 0x20d   :  { %v1377_v28 = vrot.slane %v1216_v24, %v3317_v18  ;;  %v1300_v24 = vadd.s32 4294967248, %v3307_v29  ;;  %v1269_v58 = vrot.slane %v3282_v2, %v3317_v18 }
 0x20f   :  { %1257 = vperm.xlu0 %2347, %v3279_v35  }
 0x210   :  { %v3284_v37 = vpop.permute.xlu1 %1170 }
 0x211   :  { %v1276_v30 = vrot.slane %v3284_v37, %v3324_v4 }
 0x214   :  { %v3286_v0 = vpop.permute.xlu1 %1173  ;;  %v1222_v63 = vpop.permute.xlu0 %1221 }
 0x215   :  { %v1387_v26 = vrot.slane %v1222_v63, %v3329_v56  ;;  %v1314_v63 = vadd.s32 4294967232, %v3307_v29 }
 0x217   :  { %v3373_v37 = vsub.s32 %v1314_v63, %v2654_v9 }
 0x218   :  { %v3288_v59 = vpop.permute.xlu1 %1176  ;;  %v1219_v7 = vpop.permute.xlu0 %1218 }
 0x219   :  { %v1382_v6 = vrot.slane %v1219_v7, %v3324_v4  ;;  %v1290_v50 = vrot.slane %v3288_v59, %v3339_v62 }
 0x229   :  { %v1228_v32 = vpop.permute.xlu0 %1227 }
 0x22d   :  { %v1225_v46 = vpop.permute.xlu0 %1224 }
 0x22e   :  { %v1392_v20 = vrot.slane %v1225_v46, %v3339_v62  ;;  %v1264_v46 = vrot.slane %v3294_v38, %v3314_v8 }
 0x244   :  { %v3290_v57 = vpop.permute.xlu1 %1179 }
 0x248   :  { %v3292_v5 = vpop.permute.xlu1 %1182 }
 0x24c   :  { %v3296_v14 = vpop.permute.xlu1 %1185 }
 0x254   :  { %v3298_v48 = vpop.permute.xlu1 %1191 }
 0x258   :  { %v3300_v60 = vpop.permute.xlu1 %1188 }
 0x25c   :  { %v3302_v17 = vpop.permute.xlu1 %1197 }
 0x260   :  { %v3304_v49 = vpop.permute.xlu1 %1194 }
 0x264   :  { %v1213_v54 = vpop.permute.xlu1 %1212 }
 0x265   :  { %v1373_v3 = vrot.slane %v1213_v54, %v3314_v8  ;;  %v1293_v54 = vadd.s32 4294967256, %v3307_v29 }
 0x266   :  { %v3310_v41 = vpop.permute.xlu0 %1233 }
 0x267   :  { %v1378_v40 = vsel %vm1270_vm3, %v1377_v28, %v1373_v3  ;;  %v3344_v7 = vsub.s32 %v1293_v54, %v2654_v9  ;;  %v1307_v3 = vadd.s32 4294967240, %v3307_v29  ;;  %v1321_v54 = vadd.s32 4294967224, %v3307_v29 }
 0x268   :  { %v1383_v61 = vsel %vm1277_vm4, %v1382_v6, %v1378_v40  ;;  %v3341_v13 = vpop.permute.xlu1 %1200  ;;  %v3350_v6 = vsub.s32 %v1300_v24, %v2654_v9  ;;  %v1283_v24 = vrot.slane %v3286_v0, %v3329_v56 }
 0x269   :  { %v1388_v28 = vsel %vm1284_vm5, %v1387_v26, %v1383_v61  ;;  %v1397_v2 = vrot.slane %v1228_v32, %v3344_v7  ;;  %v3368_v18 = vsub.s32 %v1307_v3, %v2654_v9  ;;  %v1297_v0 = vrot.slane %v3290_v57, %v3344_v7 }
 0x26a   :  { %v1231_v19 = vpop.permute.xlu0 %1230  ;;  %v1393_v26 = vsel %vm1291_vm6, %v1392_v20, %v1388_v28  ;;  %v1328_v20 = vadd.s32 4294967216, %v3307_v29  ;;  %v1271_v28 = vsel %vm1270_vm3, %v1269_v58, %v1264_v46  ;;  %v3382_v32 = vsub.s32 %v1321_v54, %v2654_v9 }
 0x26b   :  { %v1402_v61 = vrot.slane %v1231_v19, %v3350_v6  ;;  %v1398_v3 = vsel %vm1298_vm7, %v1397_v2, %v1393_v26  ;;  %v1278_v59 = vsel %vm1277_vm4, %v1276_v30, %v1271_v28  ;;  %v1304_v63 = vrot.slane %v3292_v5, %v3350_v6 }
 0x26c   :  { %v3376_v19 = vpop.permute.xlu1 %1203  ;;  %v1285_v8 = vsel %vm1284_vm5, %v1283_v24, %v1278_v59  ;;  %v1311_v58 = vrot.slane %v3296_v14, %v3368_v18  ;;  %v1335_v57 = vadd.s32 4294967208, %v3307_v29  ;;  %v1407_v54 = vrot.slane %v3310_v41, %v3368_v18 }
 0x26d   :  { %v1403_v62 = vsel %vm1305_vm8, %v1402_v61, %v1398_v3  ;;  %v1292_v26 = vsel %vm1291_vm6, %v1290_v50, %v1285_v8  ;;  %v1318_v30 = vrot.slane %v3300_v60, %v3373_v37  ;;  %v3400_v5 = vsub.s32 %v1328_v20, %v2654_v9 }
 0x26e   :  { %v3326_v10 = vpop.permute.xlu0 %1239  ;;  %v1299_v46 = vsel %vm1298_vm7, %v1297_v0, %v1292_v26  ;;  %v1349_v14 = vadd.s32 4294967192, %v3307_v29  ;;  %v1408_v24 = vsel %vm1312_vm9, %v1407_v54, %v1403_v62  ;;  %v1356_v50 = vadd.s32 4294967184, %v3307_v29 }
 0x26f   :  { %v1306_v41 = vsel %vm1305_vm8, %v1304_v63, %v1299_v46  ;;  %v3412_v28 = vsub.s32 %v1335_v57, %v2654_v9  ;;  %v1417_v0 = vrot.slane %v3326_v10, %v3382_v32  ;;  %v1363_v3 = vadd.s32 4294967176, %v3307_v29 }
 0x270   :  { %v1207_v8 = vpop.permute.xlu1 %1206  ;;  %v1313_v20 = vsel %vm1312_vm9, %v1311_v58, %v1306_v41  ;;  %v1332_v59 = vrot.slane %v3304_v49, %v3400_v5  ;;  %v1325_v63 = vrot.slane %v3298_v48, %v3382_v32  ;;  %v3426_v58 = vsub.s32 %v1349_v14, %v2654_v9 }
 0x271   :  { %v1320_v62 = vsel %vm1319_vm10, %v1318_v30, %v1313_v20  ;;  %v3436_v26 = vsub.s32 %v1363_v3, %v2654_v9 }
 0x272   :  { %v1237_v52 = vpop.permute.xlu0 %1236  ;;  %v1327_v54 = vsel %vm1326_vm11, %v1325_v63, %v1320_v62  ;;  %v1353_v41 = vrot.slane %v3376_v19, %v3426_v58 }
 0x273   :  { %v1412_v56 = vrot.slane %v1237_v52, %v3373_v37  ;;  %v1342_v52 = vadd.s32 4294967200, %v3307_v29  ;;  %v3430_v29 = vsub.s32 %v1356_v50, %v2654_v9  ;;  %v1334_v30 = vsel %vm1333_vm12, %v1332_v59, %v1327_v54 }
 0x274   :  { %v1210_v46 = vpop.permute.xlu1 %1209 }
 0x275   :  { %v1413_v60 = vsel %vm1319_vm10, %v1412_v56, %v1408_v24  ;;  %v3421_v56 = vsub.s32 %v1342_v52, %v2654_v9  ;;  %v1339_v24 = vrot.slane %v3302_v17, %v3412_v28 }
 0x276   :  { %v3353_v40 = vpop.permute.xlu0 %1245  ;;  %v1418_v10 = vsel %vm1326_vm11, %v1417_v0, %v1413_v60 }
 0x277   :  { %v1427_v48 = vrot.slane %v3353_v40, %v3412_v28  ;;  %v1346_v52 = vrot.slane %v3341_v13, %v3421_v56  ;;  %v1360_v40 = vrot.slane %v1207_v8, %v3430_v29  ;;  %v1341_v13 = vsel %vm3762_vm13, %v1339_v24, %v1334_v30 }
 0x279   :  { %v1348_v20 = vsel %vm3763_vm14, %v1346_v52, %v1341_v13 }
 0x27a   :  { %v1243_v38 = vpop.permute.xlu0 %1242  ;;  %v1355_v19 = vsel %vm1354_vm15, %v1353_v41, %v1348_v20 }
 0x27b   :  { %v1422_v2 = vrot.slane %v1243_v38, %v3400_v5  ;;  %v1362_v62 = vsel %vm1361_vm0, %v1360_v40, %v1355_v19 }
 0x27d   :  { %v1423_v57 = vsel %vm1333_vm12, %v1422_v2, %v1418_v10  ;;  %v1367_v2 = vrot.slane %v1210_v46, %v3436_v26 }
 0x27e   :  { %v1252_v61 = vpop.permute.xlu0 %1251  ;;  %v1428_v9 = vsel %vm3762_vm13, %v1427_v48, %v1423_v57  ;;  %vm3765_vm13 = vcmask 1041408   ;;  %v2565_v57 = vmov -inf  }
 0x27f   :  { %v1437_v17 = vrot.slane %v1252_v61, %v3426_v58 }
 0x282   :  { %v1249_v38 = vpop.permute.xlu0 %1248 }
 0x283   :  { %v1432_v49 = vrot.slane %v1249_v38, %v3421_v56  ;;  %v1369_v38 = vsel %vm1368_vm2, %v1367_v2, %v1362_v62 }
 0x285   :  { %v1433_v50 = vsel %vm3763_vm14, %v1432_v49, %v1428_v9  ;;  %vm3764_vm14 = vcmask 1024   ;;  %v3780_v49 = vmov 0.0  }
 0x286   :  { %v1255_v14 = vpop.permute.xlu0 %1254  ;;  %v1438_v3 = vsel %vm1354_vm15, %v1437_v17, %v1433_v50  ;;  %42 = vst.msk [vmem:[#allocation2] sm:$0x3] %vm3764_vm14, %v2565_v57  ;;  %43 = vst.msk [vmem:[#allocation3] sm:$0x3] %vm3764_vm14, %v3780_v49 }
 0x287   :  { %v1442_v60 = vrot.slane %v1255_v14, %v3430_v29 }
 0x289   :  { %v1443_v59 = vsel %vm1361_vm0, %v1442_v60, %v1438_v3 }
 0x28a   :  { %v1258_v0 = vpop.permute.xlu0 %1257 }
 0x28b   :  { %v1447_v8 = vrot.slane %v1258_v0, %v3436_v26 }
 0x28d   :  { %v1448_v61 = vsel %vm1368_vm2, %v1447_v8, %v1443_v59  ;;  %v3467_v54 = vld [vmem:[#allocation2] sm:$0x3] }
 0x28e   :  { %v1450_v63 = vsel %vm1449_vm1, %v1448_v61, %v1369_v38 }
 0x28f   :  { %v1455_v10 = vsel %vm3765_vm13, %v1450_v63, -inf  ;;  %1452 = vst [vmem:[#allocation11] sm:$0x3] %v1450_v63  ;;  %vm3796_vm13 = vcmask 851712  }
 0x290   :  { %1456 = vmax.xlane.f32.xlu1 %v1455_v10 }
 0x319   :  { %v1457_v48 = vpop.xlane.xlu1 %1456 }
 0x31a   :  { %v3470_v30 = vmax.f32 %v3467_v54, %v1457_v48 }
 0x31c   :  { %v1459_v52 = vsub.f32 %v3467_v54, %v3470_v30  ;;  %2025 = vst.msk [vmem:[#allocation2] sm:$0x3] %vm3764_vm14, %v3470_v30  ;;  %1464 = vperm.xlu0 %2347, %v3470_v30   ;;  %vm3795_vm14 = vcmask 786112  }
 0x397   :  { %v1465_v46 = vpop.permute.xlu0 %1464 }
 0x398   :  { %v3478_v14 = vrot.slane %v1465_v46, %v2682_v15  ;;  %v3489_v13 = vrot.slane %v1465_v46, %v2685_v16 }
 0x39a   :  { %v1484_v24 = vsub.f32 %v3225_v44, %v3478_v14  ;;  %v1476_v41 = vsub.f32 %v3174_v45, %v3478_v14  ;;  %v1489_v9 = vsub.f32 %v3246_v22, %v3478_v14  ;;  %v1477_v40 = vsub.f32 %v3186_v53, %v3478_v14 }
 0x39b   :  { %v1491_v2 = vsub.f32 %v3260_v1, %v3478_v14  ;;  %v1478_v45 = vsub.f32 %v3192_v33, %v3478_v14  ;;  %v1493_v53 = vsub.f32 %v3188_v11, %v3489_v13  ;;  %v1479_v16 = vsub.f32 %v3195_v47, %v3478_v14 }
 0x39c   :  { %v1524_v50 = vmul.f32 1.442695, %v1484_v24  ;;  %v1508_v60 = vmul.f32 1.442695, %v1476_v41  ;;  %v1534_v15 = vmul.f32 1.442695, %v1489_v9  ;;  %v1495_v1 = vsub.f32 %v3197_v51, %v3489_v13 }
 0x39d   :  { %v1510_v44 = vmul.f32 1.442695, %v1477_v40  ;;  %v1538_v22 = vmul.f32 1.442695, %v1491_v2  ;;  %v1512_v17 = vmul.f32 1.442695, %v1478_v45  ;;  %v1480_v33 = vsub.f32 %v3201_v55, %v3478_v14 }
 0x39e   :  { %2413 = vpow2.f32 %v1524_v50  ;;  %v1542_v20 = vmul.f32 1.442695, %v1493_v53  ;;  %v1514_v0 = vmul.f32 1.442695, %v1479_v16  ;;  %v1546_v19 = vmul.f32 1.442695, %v1495_v1 }
 0x39f   :  { %2415 = vpow2.f32 %v1508_v60  ;;  %v1497_v11 = vsub.f32 %v3207_v43, %v3489_v13  ;;  %v1516_v8 = vmul.f32 1.442695, %v1480_v33  ;;  %v1481_v47 = vsub.f32 %v3213_v27, %v3478_v14  ;;  %v3781_v16 = vld [vmem:[#allocation17_spill] sm:$0xff]  ;;  %v3782_v33 = vld [vmem:[#allocation19_spill] sm:$0xff] }
 0x3a0   :  { %2417 = vpow2.f32 %v1534_v15  ;;  %v1499_v59 = vsub.f32 %v3238_v23, %v3489_v13  ;;  %v1482_v43 = vsub.f32 %v3216_v36, %v3478_v14  ;;  %v1501_v27 = vsub.f32 %v3250_v42, %v3489_v13 }
 0x3a1   :  { %2419 = vpow2.f32 %v1510_v44  ;;  %v1550_v51 = vmul.f32 1.442695, %v1497_v11  ;;  %v1518_v38 = vmul.f32 1.442695, %v1481_v47  ;;  %v1483_v23 = vsub.f32 %v3219_v39, %v3478_v14  ;;  %v3783_v47 = vld [vmem:[#allocation16_spill] sm:$0xff] }
 0x3a2   :  { %2421 = vpow2.f32 %v1538_v22  ;;  %v1554_v63 = vmul.f32 1.442695, %v1499_v59  ;;  %v1520_v57 = vmul.f32 1.442695, %v1482_v43  ;;  %v1558_v46 = vmul.f32 1.442695, %v1501_v27 }
 0x3a3   :  { %2423 = vpow2.f32 %v1512_v17  ;;  %v1503_v36 = vsub.f32 %v3264_v12, %v3489_v13  ;;  %v1522_v41 = vmul.f32 1.442695, %v1483_v23  ;;  %v1485_v42 = vsub.f32 %v3222_v25, %v3478_v14  ;;  %v3785_v43 = vld [vmem:[#allocation15_spill] sm:$0xff] }
 0x3a4   :  { %2425 = vpow2.f32 %v1542_v20  ;;  %v1505_v39 = vsub.f32 %v3270_v21, %v3489_v13  ;;  %v1486_v12 = vsub.f32 %v3231_v31, %v3478_v14  ;;  %v1507_v25 = vsub.f32 %v3279_v35, %v3489_v13 }
 0x3a5   :  { %2427 = vpow2.f32 %v1514_v0  ;;  %v1562_v40 = vmul.f32 1.442695, %v1503_v36  ;;  %v1526_v60 = vmul.f32 1.442695, %v1485_v42  ;;  %v1487_v21 = vsub.f32 %v3228_v34, %v3478_v14  ;;  %v3787_v36 = vld [vmem:[#allocation20_spill] sm:$0xff] }
 0x3a6   :  { %2429 = vpow2.f32 %v1546_v19  ;;  %v1566_v2 = vmul.f32 1.442695, %v1505_v39  ;;  %v1528_v45 = vmul.f32 1.442695, %v1486_v12  ;;  %v1570_v53 = vmul.f32 1.442695, %v1507_v25 }
 0x3a7   :  { %2431 = vpow2.f32 %v1516_v8  ;;  %v1530_v17 = vmul.f32 1.442695, %v1487_v21  ;;  %v1488_v20 = vsub.f32 %v3781_v16, %v3478_v14  ;;  %v1460_v35 = vmul.f32 1.442695, %v1459_v52  ;;  %v3784_v52 = vld [vmem:[#allocation14_spill] sm:$0xff]  ;;  %v3790_v25 = vld [vmem:[#allocation23_spill] sm:$0xff] }
 0x3a8   :  { %2433 = vpow2.f32 %v1550_v51  ;;  %v1490_v19 = vsub.f32 %v3782_v33, %v3478_v14  ;;  %v1494_v59 = vsub.f32 %v3784_v52, %v3489_v13  ;;  %v3791_v52 = vld [vmem:[#allocation25_spill] sm:$0xff] }
 0x3a9   :  { %2435 = vpow2.f32 %v1518_v38  ;;  %v1532_v0 = vmul.f32 1.442695, %v1488_v20 }
 0x3aa   :  { %2437 = vpow2.f32 %v1554_v63  ;;  %v1536_v8 = vmul.f32 1.442695, %v1490_v19  ;;  %v1544_v38 = vmul.f32 1.442695, %v1494_v59 }
 0x3ab   :  { %v2414_v3 = vpop.eup %2413  ;;  %2439 = vpow2.f32 %v1520_v57  ;;  %v3786_v57 = vld [vmem:[#allocation18_spill] sm:$0xff] }
 0x3ac   :  { %v2416_v62 = vpop.eup %2415  ;;  %1631 = vperm.xlu1 %2348, %v2414_v3   ;;  %2441 = vpow2.f32 %v1558_v46  ;;  %v1498_v23 = vsub.f32 %v3786_v57, %v3489_v13  ;;  %v3794_v57 = vld [vmem:[#allocation27_spill] sm:$0xff] }
 0x3ad   :  { %1607 = vperm.xlu0 %2347, %v2416_v62   ;;  %v2418_v55 = vpop.eup %2417  ;;  %2443 = vpow2.f32 %v1522_v41  ;;  %v1492_v62 = vsub.f32 %v3783_v47, %v3489_v13 }
 0x3ae   :  { %v2420_v61 = vpop.eup %2419  ;;  %2445 = vpow2.f32 %v1562_v40  ;;  %v1552_v46 = vmul.f32 1.442695, %v1498_v23 }
 0x3af   :  { %v2422_v10 = vpop.eup %2421  ;;  %2447 = vpow2.f32 %v1526_v60  ;;  %v1540_v30 = vmul.f32 1.442695, %v1492_v62  ;;  %v3789_v60 = vld [vmem:[#allocation22_spill] sm:$0xff] }
 0x3b0   :  { %1646 = vperm.xlu1 %2348, %v2418_v55   ;;  %v2424_v48 = vpop.eup %2423  ;;  %2449 = vpow2.f32 %v1566_v2  ;;  %v1504_v12 = vsub.f32 %v3789_v60, %v3489_v13 }
 0x3b1   :  { %1610 = vperm.xlu0 %2347, %v2420_v61   ;;  %v2426_v24 = vpop.eup %2425  ;;  %2451 = vpow2.f32 %v1528_v45  ;;  %v1496_v61 = vsub.f32 %v3785_v43, %v3489_v13 }
 0x3b2   :  { %v2428_v9 = vpop.eup %2427  ;;  %2453 = vpow2.f32 %v1570_v53  ;;  %v1564_v2 = vmul.f32 1.442695, %v1504_v12 }
 0x3b3   :  { %v2430_v50 = vpop.eup %2429  ;;  %2455 = vpow2.f32 %v1530_v17 }
 0x3b4   :  { %1652 = vperm.xlu1 %2348, %v2422_v10   ;;  %v2432_v15 = vpop.eup %2431  ;;  %2457 = vpow2.f32 %v1460_v35  ;;  %v1548_v10 = vmul.f32 1.442695, %v1496_v61  ;;  %v3793_v61 = vld [vmem:[#allocation26_spill] sm:$0xff] }
 0x3b5   :  { %1613 = vperm.xlu0 %2347, %v2424_v48   ;;  %v2434_v44 = vpop.eup %2433  ;;  %2459 = vpow2.f32 %v1532_v0 }
 0x3b6   :  { %v2436_v22 = vpop.eup %2435  ;;  %2461 = vpow2.f32 %v1536_v8 }
 0x3b7   :  { %v2438_v31 = vpop.eup %2437  ;;  %2463 = vpow2.f32 %v1540_v30 }
 0x3b8   :  { %1658 = vperm.xlu1 %2348, %v2426_v24   ;;  %v2440_v1 = vpop.eup %2439  ;;  %2465 = vpow2.f32 %v1544_v38  ;;  %v1500_v24 = vsub.f32 %v3787_v36, %v3489_v13  ;;  %v3792_v38 = vld [vmem:[#allocation24_spill] sm:$0xff] }
 0x3b9   :  { %1616 = vperm.xlu0 %2347, %v2428_v9   ;;  %v2442_v34 = vpop.eup %2441  ;;  %2467 = vpow2.f32 %v1548_v10  ;;  %v3788_v9 = vld [vmem:[#allocation21_spill] sm:$0xff] }
 0x3ba   :  { %v2444_v11 = vpop.eup %2443  ;;  %2469 = vpow2.f32 %v1552_v46  ;;  %v1556_v42 = vmul.f32 1.442695, %v1500_v24  ;;  %v1502_v40 = vsub.f32 %v3788_v9, %v3489_v13 }
 0x3bb   :  { %v2446_v3 = vpop.eup %2445 }
 0x3bc   :  { %1664 = vperm.xlu1 %2348, %v2430_v50   ;;  %v2448_v51 = vpop.eup %2447  ;;  %2471 = vpow2.f32 %v1556_v42  ;;  %v1560_v50 = vmul.f32 1.442695, %v1502_v40 }
 0x3bd   :  { %1619 = vperm.xlu0 %2347, %v2432_v15   ;;  %v2450_v54 = vpop.eup %2449 }
 0x3be   :  { %v2452_v14 = vpop.eup %2451  ;;  %2473 = vpow2.f32 %v1560_v50 }
 0x3bf   :  { %v2454_v55 = vpop.eup %2453  ;;  %2475 = vpow2.f32 %v1564_v2 }
 0x3c0   :  { %1670 = vperm.xlu1 %2348, %v2434_v44   ;;  %v2456_v63 = vpop.eup %2455  ;;  %v1506_v44 = vsub.f32 %v3790_v25, %v3489_v13 }
 0x3c1   :  { %1622 = vperm.xlu0 %2347, %v2436_v22   ;;  %v3540_v27 = vpop.eup %2457 }
 0x3c2   :  { %v2460_v48 = vpop.eup %2459  ;;  %v1568_v21 = vmul.f32 1.442695, %v1506_v44 }
 0x3c3   :  { %v2462_v41 = vpop.eup %2461 }
 0x3c4   :  { %1676 = vperm.xlu1 %2348, %v2438_v31   ;;  %v2464_v39 = vpop.eup %2463  ;;  %2477 = vpow2.f32 %v1568_v21  ;;  %v2026_v21 = vld [vmem:[#allocation5] sm:$0x3] }
 0x3c5   :  { %1625 = vperm.xlu0 %2347, %v2440_v1   ;;  %v2466_v15 = vpop.eup %2465 }
 0x3c6   :  { %v2468_v45 = vpop.eup %2467 }
 0x3c7   :  { %v2470_v22 = vpop.eup %2469 }
 0x3c8   :  { %1682 = vperm.xlu1 %2348, %v2442_v34  }
 0x3c9   :  { %1628 = vperm.xlu0 %2347, %v2444_v11   ;;  %v2472_v53 = vpop.eup %2471 }
 0x3cb   :  { %v2474_v31 = vpop.eup %2473 }
 0x3cc   :  { %1688 = vperm.xlu1 %2348, %v2446_v3   ;;  %v2476_v17 = vpop.eup %2475 }
 0x3cd   :  { %1634 = vperm.xlu0 %2347, %v2448_v51  }
 0x3d0   :  { %1694 = vperm.xlu1 %2348, %v2450_v54  }
 0x3d1   :  { %1637 = vperm.xlu0 %2347, %v2452_v14   ;;  %v2478_v16 = vpop.eup %2477 }
 0x3d4   :  { %1700 = vperm.xlu1 %2348, %v2454_v55  }
 0x3d5   :  { %1640 = vperm.xlu0 %2347, %v2456_v63  }
 0x3d8   :  { %1871 = vperm.xlu1 %2348, %v3540_v27  }
 0x3d9   :  { %1643 = vperm.xlu0 %2347, %v2460_v48  }
 0x3dd   :  { %1649 = vperm.xlu0 %2347, %v2462_v41  }
 0x3e1   :  { %1655 = vperm.xlu0 %2347, %v2464_v39  }
 0x3e5   :  { %1661 = vperm.xlu0 %2347, %v2466_v15  }
 0x3e9   :  { %1667 = vperm.xlu0 %2347, %v2468_v45  }
 0x3ed   :  { %1673 = vperm.xlu0 %2347, %v2470_v22  }
 0x3f1   :  { %1679 = vperm.xlu0 %2347, %v2472_v53  }
 0x3f5   :  { %1685 = vperm.xlu0 %2347, %v2474_v31  }
 0x3f9   :  { %1691 = vperm.xlu0 %2347, %v2476_v17  }
 0x3fd   :  { %1697 = vperm.xlu0 %2347, %v2478_v16  }
 0x427   :  { %v1632_v20 = vpop.permute.xlu1 %1631 }
 0x428   :  { %v1608_v1 = vpop.permute.xlu0 %1607  ;;  %v1744_v44 = vrot.slane %v1632_v20, %v3373_v37 }
 0x429   :  { %v1705_v43 = vrot.slane %v1608_v1, %v3792_v38 }
 0x42b   :  { %v1647_v35 = vpop.permute.xlu1 %1646 }
 0x42c   :  { %v1611_v34 = vpop.permute.xlu0 %1610 }
 0x42d   :  { %v1709_v59 = vrot.slane %v1611_v34, %v3791_v52 }
 0x42f   :  { %v1653_v13 = vpop.permute.xlu1 %1652  ;;  %v1710_v48 = vsel %vm1270_vm3, %v1709_v59, %v1705_v43 }
 0x430   :  { %v1614_v0 = vpop.permute.xlu0 %1613 }
 0x431   :  { %v1714_v14 = vrot.slane %v1614_v0, %v3324_v4 }
 0x433   :  { %v3553_v33 = vpop.permute.xlu1 %1658  ;;  %v1715_v36 = vsel %vm1277_vm4, %v1714_v14, %v1710_v48 }
 0x434   :  { %v1617_v19 = vpop.permute.xlu0 %1616 }
 0x435   :  { %v1719_v63 = vrot.slane %v1617_v19, %v3793_v61 }
 0x437   :  { %v3555_v11 = vpop.permute.xlu1 %1664  ;;  %v1720_v42 = vsel %vm1284_vm5, %v1719_v63, %v1715_v36  ;;  %v2483_v36 = vld [vmem:[%s3728_s0 + $0xe8] sm:$0xff] }
 0x438   :  { %v1620_v3 = vpop.permute.xlu0 %1619 }
 0x439   :  { %v1724_v23 = vrot.slane %v1620_v3, %v3794_v57  ;;  %v1769_v3 = vrot.slane %v1647_v35, %v3426_v58  ;;  %v2481_v35 = vld [vmem:[%s3728_s0 + $0xf8] sm:$0xff] }
 0x43b   :  { %v3557_v8 = vpop.permute.xlu1 %1670  ;;  %v1725_v39 = vsel %vm1291_vm6, %v1724_v23, %v1720_v42  ;;  %v2482_v23 = vld [vmem:[%s3728_s0 + $0xf0] sm:$0xff] }
 0x43c   :  { %v1623_v47 = vpop.permute.xlu0 %1622 }
 0x43d   :  { %v1729_v46 = vrot.slane %v1623_v47, %v3344_v7 }
 0x43f   :  { %v3559_v62 = vpop.permute.xlu1 %1676  ;;  %v1730_v50 = vsel %vm1298_vm7, %v1729_v46, %v1725_v39 }
 0x440   :  { %v1626_v51 = vpop.permute.xlu0 %1625 }
 0x441   :  { %v1734_v24 = vrot.slane %v1626_v51, %v3350_v6 }
 0x443   :  { %v3561_v54 = vpop.permute.xlu1 %1682  ;;  %v1735_v60 = vsel %vm1305_vm8, %v1734_v24, %v1730_v50 }
 0x444   :  { %v1629_v30 = vpop.permute.xlu0 %1628 }
 0x445   :  { %v1739_v9 = vrot.slane %v1629_v30, %v3368_v18  ;;  %v1779_v30 = vrot.slane %v1653_v13, %v3436_v26  ;;  %v1788_v13 = vrot.slane %v3553_v33, %v3791_v52  ;;  %v1798_v33 = vrot.slane %v3555_v11, %v3793_v61  ;;  %v2486_v61 = vld [vmem:[%s3728_s0 + $0xd0] sm:$0xff] }
 0x446   :  { %v1808_v11 = vrot.slane %v3557_v8, %v3344_v7  ;;  %v1818_v7 = vrot.slane %v3559_v62, %v3368_v18  ;;  %v1828_v18 = vrot.slane %v3561_v54, %v3382_v32 }
 0x447   :  { %v3565_v55 = vpop.permute.xlu1 %1688  ;;  %v1740_v15 = vsel %vm1312_vm9, %v1739_v9, %v1735_v60 }
 0x448   :  { %v1635_v10 = vpop.permute.xlu0 %1634  ;;  %v1745_v53 = vsel %vm1319_vm10, %v1744_v44, %v1740_v15  ;;  %v2487_v15 = vld [vmem:[%s3728_s0 + $0xc8] sm:$0xff] }
 0x449   :  { %v1749_v2 = vrot.slane %v1635_v10, %v3382_v32  ;;  %v1838_v32 = vrot.slane %v3565_v55, %v3412_v28 }
 0x44b   :  { %v3574_v41 = vpop.permute.xlu1 %1694  ;;  %v1750_v17 = vsel %vm1326_vm11, %v1749_v2, %v1745_v53 }
 0x44c   :  { %v1638_v40 = vpop.permute.xlu0 %1637 }
 0x44d   :  { %v1754_v45 = vrot.slane %v1638_v40, %v3400_v5  ;;  %v2485_v40 = vld [vmem:[%s3728_s0 + $0xd8] sm:$0xff] }
 0x44f   :  { %v3581_v12 = vpop.permute.xlu1 %1700  ;;  %v1755_v34 = vsel %vm1333_vm12, %v1754_v45, %v1750_v17  ;;  %v2489_v45 = vld [vmem:[%s3728_s0 + $0xb8] sm:$0xff]  ;;  %v2491_v17 = vld [vmem:[%s3728_s0 + $0xa8] sm:$0xff] }
 0x450   :  { %v1641_v25 = vpop.permute.xlu0 %1640 }
 0x451   :  { %v1759_v22 = vrot.slane %v1641_v25, %v3412_v28  ;;  %v1848_v28 = vrot.slane %v3574_v41, %v3426_v58 }
 0x453   :  { %v3589_v31 = vpop.permute.xlu1 %1871  ;;  %v1760_v20 = vsel %vm3795_vm14, %v1759_v22, %v1755_v34 }
 0x454   :  { %v1644_v16 = vpop.permute.xlu0 %1643  ;;  %v2027_v1 = vmul.f32 %v2026_v21, %v3589_v31 }
 0x455   :  { %v1764_v0 = vrot.slane %v1644_v16, %v3421_v56 }
 0x456   :  { %2028 = vst [vmem:[#allocation5] sm:$0x3] %v2027_v1 }
 0x457   :  { %v1765_v19 = vsel %vm3796_vm13, %v1764_v0, %v1760_v20  ;;  %vm3797_vm13 = vmmov 0   ;;  %v2493_v0 = vld [vmem:[%s3728_s0 + $0x98] sm:$0xff] }
 0x458   :  { %v1650_v47 = vpop.permute.xlu0 %1649  ;;  %v1770_v59 = vsel %vm1354_vm15, %v1769_v3, %v1765_v19  ;;  %v1858_v3 = vrot.slane %v3581_v12, %v3436_v26 }
 0x459   :  { %v1774_v51 = vrot.slane %v1650_v47, %v3430_v29 }
 0x45b   :  { %v1775_v14 = vsel %vm1361_vm0, %v1774_v51, %v1770_v59  ;;  %v2495_v51 = vld [vmem:[%s3728_s0 + $0x88] sm:$0xff] }
 0x45c   :  { %v1656_v43 = vpop.permute.xlu0 %1655  ;;  %v3603_v63 = vsel %vm1368_vm2, %v1779_v30, %v1775_v14  ;;  %v1572_v30 = vld [vmem:[#allocation3] sm:$0x3] }
 0x45d   :  { %2302 = vmatmul.mubr.f32.vlgmr.msra.gmra.mxu0 %v3603_v63  ;;  %v1784_v10 = vrot.slane %v1656_v43, %v3792_v38  ;;  %v1573_v59 = vmul.f32 %v3540_v27, %v1572_v30 }
 0x45e   :  { %2305 = vmatpush3.msra.mxu0 %v2481_v35  ;;  %2336 = vmatprep.mubr.msk.f32.mxu0 %vm3797_vm13, %v3780_v49 }
 0x45f   :  { %2306 = vmatprep.subr.mxu0 %v3780_v49  ;;  %v1789_v46 = vsel %vm1270_vm3, %v1788_v13, %v1784_v10  ;;  %vm3798_vm3 = vmmov %vm3795_vm14 }
 0x460   :  { %2307 = vmatpush3.msra.mxu0 %v2482_v23  ;;  %v1662_v48 = vpop.permute.xlu0 %1661 }
 0x461   :  { %v1793_v38 = vrot.slane %v1662_v48, %v3324_v4  ;;  %2308 = vmatprep.subr.mxu0 %v3780_v49  ;;  %v2484_v4 = vld [vmem:[%s3728_s0 + $0xe0] sm:$0xff] }
 0x462   :  { %2309 = vmatpush3.msra.mxu0 %v2483_v36 }
 0x463   :  { %v1794_v24 = vsel %vm1277_vm4, %v1793_v38, %v1789_v46  ;;  %2310 = vmatprep.subr.mxu0 %v3780_v49  ;;  %vm3799_vm4 = vcmask 851712  }
 0x464   :  { %2311 = vmatpush3.msra.mxu0 %v2484_v4  ;;  %v1668_v52 = vpop.permute.xlu0 %1667  ;;  %v1799_v9 = vsel %vm1284_vm5, %v1798_v33, %v1794_v24  ;;  %vm3800_vm5 = vcmask 1041408  }
 0x465   :  { %v1803_v42 = vrot.slane %v1668_v52, %v3794_v57  ;;  %2312 = vmatprep.subr.mxu0 %v3780_v49 }
 0x466   :  { %2313 = vmatpush3.msra.mxu0 %v2485_v40 }
 0x467   :  { %v1804_v39 = vsel %vm1291_vm6, %v1803_v42, %v1799_v9  ;;  %2314 = vmatprep.subr.mxu0 %v3780_v49  ;;  %vm3801_vm6 = vcmask 1024  }
 0x468   :  { %2315 = vmatpush3.msra.mxu0 %v2486_v61  ;;  %v1674_v57 = vpop.permute.xlu0 %1673  ;;  %v1809_v60 = vsel %vm1298_vm7, %v1808_v11, %v1804_v39 }
 0x469   :  { %v1813_v50 = vrot.slane %v1674_v57, %v3350_v6  ;;  %2316 = vmatprep.subr.mxu0 %v3780_v49  ;;  %v2488_v6 = vld [vmem:[%s3728_s0 + $0xc0] sm:$0xff] }
 0x46a   :  { %2317 = vmatpush3.msra.mxu0 %v2487_v15 }
 0x46b   :  { %v1814_v2 = vsel %vm1305_vm8, %v1813_v50, %v1809_v60  ;;  %2318 = vmatprep.subr.mxu0 %v3780_v49 }
 0x46c   :  { %2319 = vmatpush3.msra.mxu0 %v2488_v6  ;;  %v1680_v8 = vpop.permute.xlu0 %1679  ;;  %v1819_v44 = vsel %vm1312_vm9, %v1818_v7, %v1814_v2 }
 0x46d   :  { %v1823_v25 = vrot.slane %v1680_v8, %v3373_v37  ;;  %2320 = vmatprep.subr.mxu0 %v3780_v49  ;;  %v2490_v37 = vld [vmem:[%s3728_s0 + $0xb0] sm:$0xff] }
 0x46e   :  { %2321 = vmatpush3.msra.mxu0 %v2489_v45 }
 0x46f   :  { %v1824_v21 = vsel %vm1319_vm10, %v1823_v25, %v1819_v44  ;;  %2322 = vmatprep.subr.mxu0 %v3780_v49 }
 0x470   :  { %2323 = vmatpush3.msra.mxu0 %v2490_v37  ;;  %v1686_v62 = vpop.permute.xlu0 %1685  ;;  %v1829_v53 = vsel %vm1326_vm11, %v1828_v18, %v1824_v21 }
 0x471   :  { %v1833_v22 = vrot.slane %v1686_v62, %v3400_v5  ;;  %2324 = vmatprep.subr.mxu0 %v3780_v49  ;;  %v2492_v5 = vld [vmem:[%s3728_s0 + $0xa0] sm:$0xff] }
 0x472   :  { %2325 = vmatpush3.msra.mxu0 %v2491_v17 }
 0x473   :  { %v1834_v16 = vsel %vm1333_vm12, %v1833_v22, %v1829_v53  ;;  %2326 = vmatprep.subr.mxu0 %v3780_v49 }
 0x474   :  { %2327 = vmatpush3.msra.mxu0 %v2492_v5  ;;  %v1692_v54 = vpop.permute.xlu0 %1691  ;;  %v1839_v34 = vsel %vm3798_vm3, %v1838_v32, %v1834_v16 }
 0x475   :  { %v1843_v1 = vrot.slane %v1692_v54, %v3421_v56  ;;  %2328 = vmatprep.subr.mxu0 %v3780_v49  ;;  %v2494_v56 = vld [vmem:[%s3728_s0 + $0x90] sm:$0xff] }
 0x476   :  { %2329 = vmatpush3.msra.mxu0 %v2493_v0 }
 0x477   :  { %v1844_v20 = vsel %vm3799_vm4, %v1843_v1, %v1839_v34  ;;  %2330 = vmatprep.subr.mxu0 %v3780_v49 }
 0x478   :  { %2331 = vmatpush3.msra.mxu0 %v2494_v56  ;;  %v1698_v55 = vpop.permute.xlu0 %1697  ;;  %v1849_v47 = vsel %vm1354_vm15, %v1848_v28, %v1844_v20 }
 0x479   :  { %v1853_v19 = vrot.slane %v1698_v55, %v3430_v29  ;;  %2332 = vmatprep.subr.mxu0 %v3780_v49  ;;  %v2496_v29 = vld [vmem:[%s3728_s0 + $0x80] sm:$0xff]  ;;  %s2566_s0 = smov [#allocation9]  }
 0x47a   :  { %2333 = vmatpush3.msra.mxu0 %v2495_v51  ;;  %s2065_s1 = sshll.u32 %s2566_s0, 4  ;;  %s2066_s1 = int_to_ptr.vmem [resolvable:$true] %s2065_s1 }
 0x47b   :  { %v1854_v58 = vsel %vm1361_vm0, %v1853_v19, %v1849_v47  ;;  %2334 = vmatprep.subr.mxu0 %v3780_v49  ;;  %s2497_s24 = scalar_lea.vmem %s2066_s1, 32  ;;  %p2502_p1 = scmp.lt.s32.totalorder %s2066_s1, %s2066_s1 }
 0x47c   :  { %2335 = vmatpush3.msra.mxu0 %v2496_v29  ;;  %v1859_v41 = vsel %vm1368_vm2, %v1858_v3, %v1854_v58  ;;  %vm3802_vm2 = vcmask 254976   ;;  %p2498_p0 = scmp.ne.s32.totalorder %s2066_s1, %s2497_s24  ;;  %p2503_p2 = scmp.lt.s32.totalorder %s2497_s24, %s2497_s24 }
 0x47d   :  { %2337 = vmatmul.mubr.f32.vlgmr.msra.gmra.mxu0 %v1859_v41  ;;  %v1860_v26 = vsel %vm1449_vm1, %v1859_v41, %v3603_v63  ;;  %v1868_v63 = vld [vmem:[#allocation4] sm:$0x3]  ;;  %vm3803_vm7 = vmmov %vm3802_vm2 }
 0x47e   :  { %v1862_v12 = vsel %vm3800_vm5, %v1860_v26, 0.0  ;;  %2032 = vst [vmem:[#allocation5] sm:$0x3] %v1860_v26  ;;  %v1874_v24 = vmul.f32 %v3589_v31, %v1868_v63  ;;  %p2504_p3 = por %p2503_p2, %p2502_p1 }
 0x47f   :  { %1863 = vadd.xlane.f32.xlu0 %v1862_v12 }
 0x480   :  { %p2505_p4 = pnand %p2504_p3, %p2498_p0 }
 0x485   :  { %v2038_v52 = vld [vmem:[#allocation5] sm:$0x3] }
 0x508   :  { %v1864_v14 = vpop.xlane.xlu0 %1863 }
 0x509   :  { %v1865_v49 = vadd.f32 %v1864_v14, %v1573_v59 }
 0x50b   :  { %1867 = vst.msk [vmem:[#allocation3] sm:$0x3] %vm3801_vm6, %v1865_v49 }
 0x512   :  { %v2033_v43 = vld [vmem:[#allocation3] sm:$0x3] }
 0x513   :  { %2479 = vrcp.f32 %v2033_v43 }
 0x51d   :  { %v1942_v10 = vpop.f32.mrf.mxu0 }
 0x51f   :  { %v2303_v35 = vpop.f32.mrf.mxu0 }
 0x520   :  { %v2480_v13 = vpop.eup %2479 }
 0x521   :  { %v2035_v23 = vmul.f32 %v2480_v13, %v2033_v43 }
 0x523   :  { %v2036_v48 = vsub.f32 2.0, %v2035_v23 }
 0x525   :  { %v2037_v38 = vmul.f32 %v2480_v13, %v2036_v48 }
 0x527   :  { %2041 = vperm.xlu1 %2348, %v2037_v38  }
 0x53d   :  { %v2013_v46 = vpop.f32.mrf.mxu0 }
 0x53e   :  { %v2019_v36 = vrot.slane %v2013_v46, 7 }
 0x53f   :  { %v2338_v33 = vpop.f32.mrf.mxu0 }
 0x540   :  { %v2020_v27 = vsel %vm1449_vm1, %v2019_v36, %v1942_v10 }
 0x541   :  { %v2022_v4 = vadd.f32 %v2020_v27, %v1874_v24 }
 0x543   :  { %2024 = vst.msk [vmem:[#allocation4] sm:$0x3] %vm3802_vm2, %v2022_v4 }
 0x54a   :  { %v2046_v42 = vld [vmem:[#allocation4] sm:$0x3] }
 0x5a2   :  { %v2042_v9 = vpop.permute.xlu1 %2041 }
 0x5a3   :  { %v2044_v40 = vmul.f32 %v2042_v9, %v2038_v52  ;;  %v2047_v39 = vmul.f32 %v2046_v42, %v2042_v9 }
 0x5a5   :  { %2045 = vst [vmem:[#allocation9] sm:$0x3] %v2044_v40  ;;  %2048 = vst.msk [vmem:[#allocation7] sm:$0x3] %vm3803_vm7, %v2047_v39 }
 0x5a6   :  { %2508 = shalt.err (!%p2505_p4)
}
 0x5a7   :  { %2068 = dma.vmem_to_hbm [thread:$0]  %s2066_s1, 32, %s3738_s10, [#allocation10]  }
 0x5a8   :  { %s2517_s2 = scalar_lea.vmem %s2056_s21, 32  ;;  %p2522_p6 = scmp.lt.s32.totalorder %s2056_s21, %s2056_s21 }
 0x5a9   :  { %p2518_p5 = scmp.ne.s32.totalorder %s2056_s21, %s2517_s2  ;;  %p2523_p7 = scmp.lt.s32.totalorder %s2517_s2, %s2517_s2 }
 0x5ab   :  { %p2524_p8 = por %p2523_p7, %p2522_p6 }
 0x5ad   :  { %p2525_p9 = pnand %p2524_p8, %p2518_p5 }
 0x5af   :  { %2528 = shalt.err (!%p2525_p9)
}
 0x5b0   :  { %2058 = dma.vmem_to_hbm [thread:$0]  %s2056_s21, 32, %s3737_s9, [#allocation8]  }
 0x5b1   :  { %s2537_s29 = scalar_lea.vmem %s2076_s23, 32  ;;  %p2542_p11 = scmp.lt.s32.totalorder %s2076_s23, %s2076_s23 }
 0x5b2   :  { %p2538_p10 = scmp.ne.s32.totalorder %s2076_s23, %s2537_s29  ;;  %p2543_p12 = scmp.lt.s32.totalorder %s2537_s29, %s2537_s29 }
 0x5b4   :  { %p2544_p13 = por %p2543_p12, %p2542_p11 }
 0x5b6   :  { %p2545_p0 = pnand %p2544_p13, %p2538_p10 }
 0x5b8   :  { %2548 = shalt.err (!%p2545_p0)
}
 0x5b9   :  { %2078 = dma.vmem_to_hbm [thread:$0]  %s2076_s23, 32, %s3739_s11, [#allocation10]  }
 0x5ba   :  { %2557 = dma.done.wait [#allocation8], 32  }
 0x5bb   :  { %2558 = vsyncadd [#allocation8], 4294967264 }
 0x5bc   :  { %2559 = dma.done.wait [#allocation10], 64  }
 0x5bd   :  { %2560 = vsyncadd [#allocation10], 4294967232 }
 0x5be   :  { %2088 = vsyncpa [#allocation8], 1 }
 0x5bf   :  { %2089 = vsyncpa [#allocation10], 1 }

</bundles_post_ra>
